<compile_context>
chip_gen: v7x
topology: tpu7x:2x2x1
jax: 0.10.0
libtpu: 0.0.40
codegen_flags: <defaults>
</compile_context>

<pallas_src>
import functools

import numpy as np
import jax
import jax.numpy as jnp
from jax.experimental import pallas as pl
from jax.experimental.pallas import tpu as pltpu

# ---- small, module-consistent configuration ---------------------------------
BATCH = 2
SEQLEN = 32          # seqlen
NUM_FILTER = 8       # num_filter
MAXPOOL = 4          # maxpoolsize
MODEL_NAME = "convolution_basset"   # 'convolution' in name -> layer2 is applied
EPS = 1e-5

K1, P1 = 15, 7       # conv1short: kernel_size=15, padding=7
K2, P2 = 5, 3        # layer2 conv: kernel_size=5, padding=3


# ---- Pallas kernel -----------------------------------------------------------
def _maxpool_rows(z, mp):
    """MaxPool1d(mp, mp) along the row axis of a 2D (rows, C) value (floor)."""
    rows, c = z.shape
    w = rows // mp                       # PyTorch MaxPool1d drops the remainder
    return jnp.max(z[:w * mp, :].reshape(w, mp, c), axis=1)


def _fused_cnn_kernel(x_ref, w1_ref, s1_ref, t1_ref, *rest,
                      B, L, C1, mp, use_layer2):
    """Whole SimpleCNN forward (eval mode) for the full batch in one invocation.

    x_ref  : (B, L + 2*P1, 4)   zero-padded input, NLC layout (channels on lanes)
    w1_ref : (K1*4, 2*C1)       [fwd | rev-comp] conv1short weights, im2col layout
    s1_ref : (1, C1)            BN1 scale = gamma / sqrt(var + eps)
    t1_ref : (1, C1)            BN1 shift = beta - mean*scale + conv_bias*scale
    (if layer2) w2_ref: (K2*C1, C2), s2_ref/t2_ref: (1, C2)
    o_ref  : (B, L2//mp, C2)  or (B, L//mp, C1) without layer2
    """
    if use_layer2:
        w2_ref, s2_ref, t2_ref, o_ref = rest
    else:
        (o_ref,) = rest

    # ---- layer 1: im2col (batch folded into matmul rows) + ONE MXU dot that
    # computes forward and reverse-complement conv together (weights are
    # concatenated along Cout), then max(fwd, rc) -> BN(eval) -> ReLU.
    xs = jnp.concatenate(
        [jnp.concatenate([x_ref[b, k:k + L, :] for k in range(K1)], axis=-1)
         for b in range(B)],
        axis=0)                                                     # (B*L, K1*4)
    z = jnp.dot(xs, w1_ref[...], preferred_element_type=jnp.float32)  # (B*L, 2*C1)
    z = jnp.maximum(z[:, :C1], z[:, C1:])                           # max(fwd, rev-comp)
    z = jnp.maximum(z * s1_ref[...] + t1_ref[...], 0.0)             # BN + ReLU
    # Dropout(0.3): identity in eval mode.

    lp1 = L // mp
    l2 = lp1 + 2 * P2 - K2 + 1
    if use_layer2:
        pad_zeros = jnp.zeros((P2, C1), jnp.float32)                # hoisted out of the loop

    for b in range(B):                   # static unroll; whole batch in one launch
        zb = _maxpool_rows(z[b * L:(b + 1) * L, :], mp)             # (lp1, C1)
        if not use_layer2:
            o_ref[b, :, :] = zb
            continue
        # ---- layer 2: zero-pad -> im2col -> one dot -> BN -> ReLU -> MaxPool
        zp = jnp.concatenate([pad_zeros, zb, pad_zeros], axis=0)    # (lp1 + 2*P2, C1)
        ys = jnp.concatenate([zp[k:k + l2, :] for k in range(K2)], axis=-1)  # (l2, K2*C1)
        y = jnp.dot(ys, w2_ref[...], preferred_element_type=jnp.float32)     # (l2, C2)
        y = jnp.maximum(y * s2_ref[...] + t2_ref[...], 0.0)         # BN (bias folded) + ReLU
        o_ref[b, :, :] = _maxpool_rows(y, mp)                       # (lp2, C2)


# ---- wrapper: full SimpleCNN.forward -----------------------------------------
def simple_cnn_forward(x_ncl, params, model_name):
    (w1, b1, g1, be1, rm1, rv1, w2, b2, g2, be2, rm2, rv2) = params
    B, Cin, L = x_ncl.shape
    C1, C2 = w1.shape[0], w2.shape[0]
    use_layer2 = "convolution" in model_name

    # NCL -> NLC (channels on the lane axis) + zero padding for conv1short.
    x_nlc = jnp.transpose(x_ncl, (0, 2, 1))
    x_pad = jnp.pad(x_nlc, ((0, 0), (P1, P1), (0, 0)))              # (B, L+2*P1, Cin)

    # conv1short weights in im2col layout (K1*Cin, C1). The reverse-complement
    # branch (flip(x,[1,2]) -> conv -> flip(out,[2])) equals convolving with
    # weights flipped along (Cin, K) because 2*P1 == K1-1; concatenate fwd and
    # rev-comp along Cout so a single matmul computes both.
    w1_f = jnp.transpose(w1, (2, 1, 0)).reshape(K1 * Cin, C1)
    w1_r = jnp.transpose(w1[:, ::-1, ::-1], (2, 1, 0)).reshape(K1 * Cin, C1)
    w1cat = jnp.concatenate([w1_f, w1_r], axis=1)                   # (K1*Cin, 2*C1)
    s1 = g1 / jnp.sqrt(rv1 + EPS)
    # Conv bias folded into the BN shift (always safe; the scale is applied
    # after the fwd/rc max inside the kernel, so it is NOT folded into weights).
    t1 = be1 - rm1 * s1 + b1 * s1

    lp1 = L // MAXPOOL
    inputs = [x_pad, w1cat, s1[None, :], t1[None, :]]
    if use_layer2:
        l2 = lp1 + 2 * P2 - K2 + 1
        lp2 = l2 // MAXPOOL
        w2_2d = jnp.transpose(w2, (2, 1, 0)).reshape(K2 * C1, C2)
        s2 = g2 / jnp.sqrt(rv2 + EPS)
        t2 = be2 - rm2 * s2 + b2 * s2
        inputs += [w2_2d, s2[None, :], t2[None, :]]
        out_shape = jax.ShapeDtypeStruct((B, lp2, C2), jnp.float32)
    else:
        out_shape = jax.ShapeDtypeStruct((B, lp1, C1), jnp.float32)

    kernel = functools.partial(_fused_cnn_kernel, B=B, L=L, C1=C1,
                               mp=MAXPOOL, use_layer2=use_layer2)

    # Entire working set (input, weights, intermediates, output) is a few KB,
    # so the whole forward runs as ONE grid-less pallas_call with everything
    # resident in VMEM: no per-layer HBM round trip, no per-grid-step overhead.
    # TODO(synk): at realistic SEQLEN/BATCH, tile the length axis with a K-1
    # halo, mark the batch axis "parallel" (v7x: 2 TensorCores, 64 MiB VMEM)
    # and feed the MXU in bf16; at these toy sizes one fused launch is fastest.
    out_nlc = pl.pallas_call(
        kernel,
        out_shape=out_shape,
        in_specs=[pl.BlockSpec(memory_space=pltpu.MemorySpace.VMEM)] * len(inputs),
        out_specs=pl.BlockSpec(memory_space=pltpu.MemorySpace.VMEM),
    )(*inputs)

    return jnp.transpose(out_nlc, (0, 2, 1))                        # back to NCL


# ---- deterministic parameter init (shapes from the module __init__) ---------
def init_params(key):
    C1, C2 = NUM_FILTER, NUM_FILTER * 2
    ks = jax.random.split(key, 12)
    w1 = 0.1 * jax.random.normal(ks[0], (C1, 4, K1), jnp.float32)
    b1 = 0.1 * jax.random.normal(ks[1], (C1,), jnp.float32)
    g1 = 1.0 + 0.1 * jax.random.normal(ks[2], (C1,), jnp.float32)
    be1 = 0.1 * jax.random.normal(ks[3], (C1,), jnp.float32)
    rm1 = 0.1 * jax.random.normal(ks[4], (C1,), jnp.float32)
    rv1 = 0.5 + jax.random.uniform(ks[5], (C1,), jnp.float32)
    w2 = 0.1 * jax.random.normal(ks[6], (C2, C1, K2), jnp.float32)
    b2 = 0.1 * jax.random.normal(ks[7], (C2,), jnp.float32)
    g2 = 1.0 + 0.1 * jax.random.normal(ks[8], (C2,), jnp.float32)
    be2 = 0.1 * jax.random.normal(ks[9], (C2,), jnp.float32)
    rm2 = 0.1 * jax.random.normal(ks[10], (C2,), jnp.float32)
    rv2 = 0.5 + jax.random.uniform(ks[11], (C2,), jnp.float32)
    return (w1, b1, g1, be1, rm1, rv1, w2, b2, g2, be2, rm2, rv2)


# ---- pure-JAX reference mirroring the PyTorch forward exactly ----------------
def _torch_conv1d(x_ncl, w_oik, b, pad):
    out = jax.lax.conv_general_dilated(
        x_ncl, w_oik, window_strides=(1,), padding=[(pad, pad)],
        dimension_numbers=("NCW", "OIW", "NCW"))
    return out + b[None, :, None]


def _bn_relu_pool_ref(o, gamma, beta, rmean, rvar, mp):
    o = (o - rmean[None, :, None]) / jnp.sqrt(rvar[None, :, None] + EPS)
    o = o * gamma[None, :, None] + beta[None, :, None]
    o = jnp.maximum(o, 0.0)
    B, C, L = o.shape
    lp = L // mp
    return jnp.max(o[:, :, :lp * mp].reshape(B, C, lp, mp), axis=-1)


def reference_forward(x, params, model_name):
    (w1, b1, g1, be1, rm1, rv1, w2, b2, g2, be2, rm2, rv2) = params
    out_f = _torch_conv1d(x, w1, b1, P1)
    out_b = _torch_conv1d(x[:, ::-1, ::-1], w1, b1, P1)[:, :, ::-1]
    o = jnp.maximum(out_f, out_b)
    o = _bn_relu_pool_ref(o, g1, be1, rm1, rv1, MAXPOOL)
    if "convolution" in model_name:
        o = _torch_conv1d(o, w2, b2, P2)
        o = _bn_relu_pool_ref(o, g2, be2, rm2, rv2, MAXPOOL)
    return o


# ---- main --------------------------------------------------------------------
if __name__ == "__main__":
    root = jax.random.PRNGKey(0)
    pkey, xkey = jax.random.split(root)
    params = init_params(pkey)
    # Input in PyTorch NCL layout: (batch, 4 one-hot channels, seqlen)
    x = jax.random.normal(xkey, (BATCH, 4, SEQLEN), jnp.float32)

    out = jax.block_until_ready(simple_cnn_forward(x, params, MODEL_NAME))
    ref = jax.block_until_ready(reference_forward(x, params, MODEL_NAME))
    assert out.shape == ref.shape, (out.shape, ref.shape)
    np.testing.assert_allclose(np.asarray(out), np.asarray(ref),
                               rtol=2e-2, atol=2e-3)
    print("KERNEL_OK")
</pallas_src>

<mosaic_0001>
module attributes {stable_mosaic.version = 11 : i64} {
  func.func @_fused_cnn_kernel(%arg0: memref<2x46x4xf32, #tpu.memory_space<vmem>>, %arg1: memref<60x16xf32, #tpu.memory_space<vmem>>, %arg2: memref<1x8xf32, #tpu.memory_space<vmem>>, %arg3: memref<1x8xf32, #tpu.memory_space<vmem>>, %arg4: memref<40x16xf32, #tpu.memory_space<vmem>>, %arg5: memref<1x16xf32, #tpu.memory_space<vmem>>, %arg6: memref<1x16xf32, #tpu.memory_space<vmem>>, %arg7: memref<2x2x16xf32, #tpu.memory_space<vmem>>) attributes {dimension_semantics = [], scalar_prefetch = 0 : i64, scratch_operands = 0 : i64, tpu.core_type = #tpu.core_type<tc>} {
    %c0 = arith.constant 0 : index
    %c0_0 = arith.constant 0 : index
    %c0_1 = arith.constant 0 : index
    %0 = vector.load %arg0[%c0, %c0_0, %c0_1] : memref<2x46x4xf32, #tpu.memory_space<vmem>>, vector<1x32x4xf32>
    %1 = vector.shape_cast %0 : vector<1x32x4xf32> to vector<32x4xf32>
    %c0_2 = arith.constant 0 : index
    %c1 = arith.constant 1 : index
    %c0_3 = arith.constant 0 : index
    %2 = vector.load %arg0[%c0_2, %c1, %c0_3] : memref<2x46x4xf32, #tpu.memory_space<vmem>>, vector<1x32x4xf32>
    %3 = vector.shape_cast %2 : vector<1x32x4xf32> to vector<32x4xf32>
    %c0_4 = arith.constant 0 : index
    %c2 = arith.constant 2 : index
    %c0_5 = arith.constant 0 : index
    %4 = vector.load %arg0[%c0_4, %c2, %c0_5] : memref<2x46x4xf32, #tpu.memory_space<vmem>>, vector<1x32x4xf32>
    %5 = vector.shape_cast %4 : vector<1x32x4xf32> to vector<32x4xf32>
    %c0_6 = arith.constant 0 : index
    %c3 = arith.constant 3 : index
    %c0_7 = arith.constant 0 : index
    %6 = vector.load %arg0[%c0_6, %c3, %c0_7] : memref<2x46x4xf32, #tpu.memory_space<vmem>>, vector<1x32x4xf32>
    %7 = vector.shape_cast %6 : vector<1x32x4xf32> to vector<32x4xf32>
    %c0_8 = arith.constant 0 : index
    %c4 = arith.constant 4 : index
    %c0_9 = arith.constant 0 : index
    %8 = vector.load %arg0[%c0_8, %c4, %c0_9] : memref<2x46x4xf32, #tpu.memory_space<vmem>>, vector<1x32x4xf32>
    %9 = vector.shape_cast %8 : vector<1x32x4xf32> to vector<32x4xf32>
    %c0_10 = arith.constant 0 : index
    %c5 = arith.constant 5 : index
    %c0_11 = arith.constant 0 : index
    %10 = vector.load %arg0[%c0_10, %c5, %c0_11] : memref<2x46x4xf32, #tpu.memory_space<vmem>>, vector<1x32x4xf32>
    %11 = vector.shape_cast %10 : vector<1x32x4xf32> to vector<32x4xf32>
    %c0_12 = arith.constant 0 : index
    %c6 = arith.constant 6 : index
    %c0_13 = arith.constant 0 : index
    %12 = vector.load %arg0[%c0_12, %c6, %c0_13] : memref<2x46x4xf32, #tpu.memory_space<vmem>>, vector<1x32x4xf32>
    %13 = vector.shape_cast %12 : vector<1x32x4xf32> to vector<32x4xf32>
    %c0_14 = arith.constant 0 : index
    %c7 = arith.constant 7 : index
    %c0_15 = arith.constant 0 : index
    %14 = vector.load %arg0[%c0_14, %c7, %c0_15] : memref<2x46x4xf32, #tpu.memory_space<vmem>>, vector<1x32x4xf32>
    %15 = vector.shape_cast %14 : vector<1x32x4xf32> to vector<32x4xf32>
    %c0_16 = arith.constant 0 : index
    %c8 = arith.constant 8 : index
    %c0_17 = arith.constant 0 : index
    %16 = vector.load %arg0[%c0_16, %c8, %c0_17] : memref<2x46x4xf32, #tpu.memory_space<vmem>>, vector<1x32x4xf32>
    %17 = vector.shape_cast %16 : vector<1x32x4xf32> to vector<32x4xf32>
    %c0_18 = arith.constant 0 : index
    %c9 = arith.constant 9 : index
    %c0_19 = arith.constant 0 : index
    %18 = vector.load %arg0[%c0_18, %c9, %c0_19] : memref<2x46x4xf32, #tpu.memory_space<vmem>>, vector<1x32x4xf32>
    %19 = vector.shape_cast %18 : vector<1x32x4xf32> to vector<32x4xf32>
    %c0_20 = arith.constant 0 : index
    %c10 = arith.constant 10 : index
    %c0_21 = arith.constant 0 : index
    %20 = vector.load %arg0[%c0_20, %c10, %c0_21] : memref<2x46x4xf32, #tpu.memory_space<vmem>>, vector<1x32x4xf32>
    %21 = vector.shape_cast %20 : vector<1x32x4xf32> to vector<32x4xf32>
    %c0_22 = arith.constant 0 : index
    %c11 = arith.constant 11 : index
    %c0_23 = arith.constant 0 : index
    %22 = vector.load %arg0[%c0_22, %c11, %c0_23] : memref<2x46x4xf32, #tpu.memory_space<vmem>>, vector<1x32x4xf32>
    %23 = vector.shape_cast %22 : vector<1x32x4xf32> to vector<32x4xf32>
    %c0_24 = arith.constant 0 : index
    %c12 = arith.constant 12 : index
    %c0_25 = arith.constant 0 : index
    %24 = vector.load %arg0[%c0_24, %c12, %c0_25] : memref<2x46x4xf32, #tpu.memory_space<vmem>>, vector<1x32x4xf32>
    %25 = vector.shape_cast %24 : vector<1x32x4xf32> to vector<32x4xf32>
    %c0_26 = arith.constant 0 : index
    %c13 = arith.constant 13 : index
    %c0_27 = arith.constant 0 : index
    %26 = vector.load %arg0[%c0_26, %c13, %c0_27] : memref<2x46x4xf32, #tpu.memory_space<vmem>>, vector<1x32x4xf32>
    %27 = vector.shape_cast %26 : vector<1x32x4xf32> to vector<32x4xf32>
    %c0_28 = arith.constant 0 : index
    %c14 = arith.constant 14 : index
    %c0_29 = arith.constant 0 : index
    %28 = vector.load %arg0[%c0_28, %c14, %c0_29] : memref<2x46x4xf32, #tpu.memory_space<vmem>>, vector<1x32x4xf32>
    %29 = vector.shape_cast %28 : vector<1x32x4xf32> to vector<32x4xf32>
    %30 = tpu.concatenate %1, %3, %5, %7, %9, %11, %13, %15, %17, %19, %21, %23, %25, %27, %29 in 1 : vector<32x4xf32>, vector<32x4xf32>, vector<32x4xf32>, vector<32x4xf32>, vector<32x4xf32>, vector<32x4xf32>, vector<32x4xf32>, vector<32x4xf32>, vector<32x4xf32>, vector<32x4xf32>, vector<32x4xf32>, vector<32x4xf32>, vector<32x4xf32>, vector<32x4xf32>, vector<32x4xf32> -> vector<32x60xf32>
    %c1_30 = arith.constant 1 : index
    %c0_31 = arith.constant 0 : index
    %c0_32 = arith.constant 0 : index
    %31 = vector.load %arg0[%c1_30, %c0_31, %c0_32] : memref<2x46x4xf32, #tpu.memory_space<vmem>>, vector<1x32x4xf32>
    %32 = vector.shape_cast %31 : vector<1x32x4xf32> to vector<32x4xf32>
    %c1_33 = arith.constant 1 : index
    %c1_34 = arith.constant 1 : index
    %c0_35 = arith.constant 0 : index
    %33 = vector.load %arg0[%c1_33, %c1_34, %c0_35] : memref<2x46x4xf32, #tpu.memory_space<vmem>>, vector<1x32x4xf32>
    %34 = vector.shape_cast %33 : vector<1x32x4xf32> to vector<32x4xf32>
    %c1_36 = arith.constant 1 : index
    %c2_37 = arith.constant 2 : index
    %c0_38 = arith.constant 0 : index
    %35 = vector.load %arg0[%c1_36, %c2_37, %c0_38] : memref<2x46x4xf32, #tpu.memory_space<vmem>>, vector<1x32x4xf32>
    %36 = vector.shape_cast %35 : vector<1x32x4xf32> to vector<32x4xf32>
    %c1_39 = arith.constant 1 : index
    %c3_40 = arith.constant 3 : index
    %c0_41 = arith.constant 0 : index
    %37 = vector.load %arg0[%c1_39, %c3_40, %c0_41] : memref<2x46x4xf32, #tpu.memory_space<vmem>>, vector<1x32x4xf32>
    %38 = vector.shape_cast %37 : vector<1x32x4xf32> to vector<32x4xf32>
    %c1_42 = arith.constant 1 : index
    %c4_43 = arith.constant 4 : index
    %c0_44 = arith.constant 0 : index
    %39 = vector.load %arg0[%c1_42, %c4_43, %c0_44] : memref<2x46x4xf32, #tpu.memory_space<vmem>>, vector<1x32x4xf32>
    %40 = vector.shape_cast %39 : vector<1x32x4xf32> to vector<32x4xf32>
    %c1_45 = arith.constant 1 : index
    %c5_46 = arith.constant 5 : index
    %c0_47 = arith.constant 0 : index
    %41 = vector.load %arg0[%c1_45, %c5_46, %c0_47] : memref<2x46x4xf32, #tpu.memory_space<vmem>>, vector<1x32x4xf32>
    %42 = vector.shape_cast %41 : vector<1x32x4xf32> to vector<32x4xf32>
    %c1_48 = arith.constant 1 : index
    %c6_49 = arith.constant 6 : index
    %c0_50 = arith.constant 0 : index
    %43 = vector.load %arg0[%c1_48, %c6_49, %c0_50] : memref<2x46x4xf32, #tpu.memory_space<vmem>>, vector<1x32x4xf32>
    %44 = vector.shape_cast %43 : vector<1x32x4xf32> to vector<32x4xf32>
    %c1_51 = arith.constant 1 : index
    %c7_52 = arith.constant 7 : index
    %c0_53 = arith.constant 0 : index
    %45 = vector.load %arg0[%c1_51, %c7_52, %c0_53] : memref<2x46x4xf32, #tpu.memory_space<vmem>>, vector<1x32x4xf32>
    %46 = vector.shape_cast %45 : vector<1x32x4xf32> to vector<32x4xf32>
    %c1_54 = arith.constant 1 : index
    %c8_55 = arith.constant 8 : index
    %c0_56 = arith.constant 0 : index
    %47 = vector.load %arg0[%c1_54, %c8_55, %c0_56] : memref<2x46x4xf32, #tpu.memory_space<vmem>>, vector<1x32x4xf32>
    %48 = vector.shape_cast %47 : vector<1x32x4xf32> to vector<32x4xf32>
    %c1_57 = arith.constant 1 : index
    %c9_58 = arith.constant 9 : index
    %c0_59 = arith.constant 0 : index
    %49 = vector.load %arg0[%c1_57, %c9_58, %c0_59] : memref<2x46x4xf32, #tpu.memory_space<vmem>>, vector<1x32x4xf32>
    %50 = vector.shape_cast %49 : vector<1x32x4xf32> to vector<32x4xf32>
    %c1_60 = arith.constant 1 : index
    %c10_61 = arith.constant 10 : index
    %c0_62 = arith.constant 0 : index
    %51 = vector.load %arg0[%c1_60, %c10_61, %c0_62] : memref<2x46x4xf32, #tpu.memory_space<vmem>>, vector<1x32x4xf32>
    %52 = vector.shape_cast %51 : vector<1x32x4xf32> to vector<32x4xf32>
    %c1_63 = arith.constant 1 : index
    %c11_64 = arith.constant 11 : index
    %c0_65 = arith.constant 0 : index
    %53 = vector.load %arg0[%c1_63, %c11_64, %c0_65] : memref<2x46x4xf32, #tpu.memory_space<vmem>>, vector<1x32x4xf32>
    %54 = vector.shape_cast %53 : vector<1x32x4xf32> to vector<32x4xf32>
    %c1_66 = arith.constant 1 : index
    %c12_67 = arith.constant 12 : index
    %c0_68 = arith.constant 0 : index
    %55 = vector.load %arg0[%c1_66, %c12_67, %c0_68] : memref<2x46x4xf32, #tpu.memory_space<vmem>>, vector<1x32x4xf32>
    %56 = vector.shape_cast %55 : vector<1x32x4xf32> to vector<32x4xf32>
    %c1_69 = arith.constant 1 : index
    %c13_70 = arith.constant 13 : index
    %c0_71 = arith.constant 0 : index
    %57 = vector.load %arg0[%c1_69, %c13_70, %c0_71] : memref<2x46x4xf32, #tpu.memory_space<vmem>>, vector<1x32x4xf32>
    %58 = vector.shape_cast %57 : vector<1x32x4xf32> to vector<32x4xf32>
    %c1_72 = arith.constant 1 : index
    %c14_73 = arith.constant 14 : index
    %c0_74 = arith.constant 0 : index
    %59 = vector.load %arg0[%c1_72, %c14_73, %c0_74] : memref<2x46x4xf32, #tpu.memory_space<vmem>>, vector<1x32x4xf32>
    %60 = vector.shape_cast %59 : vector<1x32x4xf32> to vector<32x4xf32>
    %61 = tpu.concatenate %32, %34, %36, %38, %40, %42, %44, %46, %48, %50, %52, %54, %56, %58, %60 in 1 : vector<32x4xf32>, vector<32x4xf32>, vector<32x4xf32>, vector<32x4xf32>, vector<32x4xf32>, vector<32x4xf32>, vector<32x4xf32>, vector<32x4xf32>, vector<32x4xf32>, vector<32x4xf32>, vector<32x4xf32>, vector<32x4xf32>, vector<32x4xf32>, vector<32x4xf32>, vector<32x4xf32> -> vector<32x60xf32>
    %62 = tpu.concatenate %30, %61 in 0 : vector<32x60xf32>, vector<32x60xf32> -> vector<64x60xf32>
    %c0_75 = arith.constant 0 : index
    %c0_76 = arith.constant 0 : index
    %63 = vector.load %arg1[%c0_75, %c0_76] : memref<60x16xf32, #tpu.memory_space<vmem>>, vector<60x16xf32>
    %cst = arith.constant dense<0.000000e+00> : vector<64x16xf32>
    %64 = tpu.matmul %62, %63, %cst {dimension_numbers = #tpu.dot_dimension_numbers<[1], [0], [0], [1], [0, 0, 1, 1], [], []>} : vector<64x60xf32>, vector<60x16xf32>, vector<64x16xf32> -> vector<64x16xf32>
    %65 = vector.extract_strided_slice %64 {offsets = [0, 0], sizes = [64, 8], strides = [1, 1]} : vector<64x16xf32> to vector<64x8xf32>
    %66 = vector.extract_strided_slice %64 {offsets = [0, 8], sizes = [64, 8], strides = [1, 1]} : vector<64x16xf32> to vector<64x8xf32>
    %67 = arith.maximumf %65, %66 : vector<64x8xf32>
    %c0_77 = arith.constant 0 : index
    %c0_78 = arith.constant 0 : index
    %68 = vector.load %arg2[%c0_77, %c0_78] : memref<1x8xf32, #tpu.memory_space<vmem>>, vector<1x8xf32>
    %69 = vector.broadcast %68 : vector<1x8xf32> to vector<64x8xf32>
    %70 = arith.mulf %67, %69 : vector<64x8xf32>
    %c0_79 = arith.constant 0 : index
    %c0_80 = arith.constant 0 : index
    %71 = vector.load %arg3[%c0_79, %c0_80] : memref<1x8xf32, #tpu.memory_space<vmem>>, vector<1x8xf32>
    %72 = vector.broadcast %71 : vector<1x8xf32> to vector<64x8xf32>
    %73 = arith.addf %70, %72 : vector<64x8xf32>
    %cst_81 = arith.constant 0.000000e+00 : f32
    %74 = vector.broadcast %cst_81 : f32 to vector<64x8xf32>
    %75 = arith.maximumf %73, %74 : vector<64x8xf32>
    %cst_82 = arith.constant 0.000000e+00 : f32
    %76 = vector.broadcast %cst_82 : f32 to vector<3x8xf32>
    %77 = vector.extract_strided_slice %75 {offsets = [0, 0], sizes = [32, 8], strides = [1, 1]} : vector<64x8xf32> to vector<32x8xf32>
    %78 = vector.shape_cast %77 : vector<32x8xf32> to vector<8x4x8xf32>
    %cst_83 = arith.constant dense<0xFF800000> : vector<8x8xf32>
    %79 = vector.multi_reduction <maximumf>, %78, %cst_83 [1] : vector<8x4x8xf32> to vector<8x8xf32>
    %80 = tpu.concatenate %76, %79, %76 in 0 : vector<3x8xf32>, vector<8x8xf32>, vector<3x8xf32> -> vector<14x8xf32>
    %81 = vector.extract_strided_slice %80 {offsets = [0, 0], sizes = [10, 8], strides = [1, 1]} : vector<14x8xf32> to vector<10x8xf32>
    %82 = vector.extract_strided_slice %80 {offsets = [1, 0], sizes = [10, 8], strides = [1, 1]} : vector<14x8xf32> to vector<10x8xf32>
    %83 = vector.extract_strided_slice %80 {offsets = [2, 0], sizes = [10, 8], strides = [1, 1]} : vector<14x8xf32> to vector<10x8xf32>
    %84 = vector.extract_strided_slice %80 {offsets = [3, 0], sizes = [10, 8], strides = [1, 1]} : vector<14x8xf32> to vector<10x8xf32>
    %85 = vector.extract_strided_slice %80 {offsets = [4, 0], sizes = [10, 8], strides = [1, 1]} : vector<14x8xf32> to vector<10x8xf32>
    %86 = tpu.concatenate %81, %82, %83, %84, %85 in 1 : vector<10x8xf32>, vector<10x8xf32>, vector<10x8xf32>, vector<10x8xf32>, vector<10x8xf32> -> vector<10x40xf32>
    %c0_84 = arith.constant 0 : index
    %c0_85 = arith.constant 0 : index
    %87 = vector.load %arg4[%c0_84, %c0_85] : memref<40x16xf32, #tpu.memory_space<vmem>>, vector<40x16xf32>
    %cst_86 = arith.constant dense<0.000000e+00> : vector<10x16xf32>
    %88 = tpu.matmul %86, %87, %cst_86 {dimension_numbers = #tpu.dot_dimension_numbers<[1], [0], [0], [1], [0, 0, 1, 1], [], []>} : vector<10x40xf32>, vector<40x16xf32>, vector<10x16xf32> -> vector<10x16xf32>
    %c0_87 = arith.constant 0 : index
    %c0_88 = arith.constant 0 : index
    %89 = vector.load %arg5[%c0_87, %c0_88] : memref<1x16xf32, #tpu.memory_space<vmem>>, vector<1x16xf32>
    %90 = vector.broadcast %89 : vector<1x16xf32> to vector<10x16xf32>
    %91 = arith.mulf %88, %90 : vector<10x16xf32>
    %c0_89 = arith.constant 0 : index
    %c0_90 = arith.constant 0 : index
    %92 = vector.load %arg6[%c0_89, %c0_90] : memref<1x16xf32, #tpu.memory_space<vmem>>, vector<1x16xf32>
    %93 = vector.broadcast %92 : vector<1x16xf32> to vector<10x16xf32>
    %94 = arith.addf %91, %93 : vector<10x16xf32>
    %cst_91 = arith.constant 0.000000e+00 : f32
    %95 = vector.broadcast %cst_91 : f32 to vector<10x16xf32>
    %96 = arith.maximumf %94, %95 : vector<10x16xf32>
    %97 = vector.extract_strided_slice %96 {offsets = [0, 0], sizes = [8, 16], strides = [1, 1]} : vector<10x16xf32> to vector<8x16xf32>
    %98 = vector.shape_cast %97 : vector<8x16xf32> to vector<2x4x16xf32>
    %cst_92 = arith.constant dense<0xFF800000> : vector<2x16xf32>
    %99 = vector.multi_reduction <maximumf>, %98, %cst_92 [1] : vector<2x4x16xf32> to vector<2x16xf32>
    %c0_93 = arith.constant 0 : index
    %c0_94 = arith.constant 0 : index
    %c0_95 = arith.constant 0 : index
    %100 = vector.load %arg7[%c0_93, %c0_94, %c0_95] : memref<2x2x16xf32, #tpu.memory_space<vmem>>, vector<1x2x16xf32>
    %101 = vector.shape_cast %100 : vector<1x2x16xf32> to vector<2x16xf32>
    %102 = vector.shape_cast %99 : vector<2x16xf32> to vector<1x2x16xf32>
    tpu.vector_store %arg7[%c0_93, %c0_94, %c0_95], %102 {strides = array<i32>} : memref<2x2x16xf32, #tpu.memory_space<vmem>>, vector<1x2x16xf32>,
    %103 = vector.extract_strided_slice %75 {offsets = [32, 0], sizes = [32, 8], strides = [1, 1]} : vector<64x8xf32> to vector<32x8xf32>
    %104 = vector.shape_cast %103 : vector<32x8xf32> to vector<8x4x8xf32>
    %cst_96 = arith.constant dense<0xFF800000> : vector<8x8xf32>
    %105 = vector.multi_reduction <maximumf>, %104, %cst_96 [1] : vector<8x4x8xf32> to vector<8x8xf32>
    %106 = tpu.concatenate %76, %105, %76 in 0 : vector<3x8xf32>, vector<8x8xf32>, vector<3x8xf32> -> vector<14x8xf32>
    %107 = vector.extract_strided_slice %106 {offsets = [0, 0], sizes = [10, 8], strides = [1, 1]} : vector<14x8xf32> to vector<10x8xf32>
    %108 = vector.extract_strided_slice %106 {offsets = [1, 0], sizes = [10, 8], strides = [1, 1]} : vector<14x8xf32> to vector<10x8xf32>
    %109 = vector.extract_strided_slice %106 {offsets = [2, 0], sizes = [10, 8], strides = [1, 1]} : vector<14x8xf32> to vector<10x8xf32>
    %110 = vector.extract_strided_slice %106 {offsets = [3, 0], sizes = [10, 8], strides = [1, 1]} : vector<14x8xf32> to vector<10x8xf32>
    %111 = vector.extract_strided_slice %106 {offsets = [4, 0], sizes = [10, 8], strides = [1, 1]} : vector<14x8xf32> to vector<10x8xf32>
    %112 = tpu.concatenate %107, %108, %109, %110, %111 in 1 : vector<10x8xf32>, vector<10x8xf32>, vector<10x8xf32>, vector<10x8xf32>, vector<10x8xf32> -> vector<10x40xf32>
    %c0_97 = arith.constant 0 : index
    %c0_98 = arith.constant 0 : index
    %113 = vector.load %arg4[%c0_97, %c0_98] : memref<40x16xf32, #tpu.memory_space<vmem>>, vector<40x16xf32>
    %cst_99 = arith.constant dense<0.000000e+00> : vector<10x16xf32>
    %114 = tpu.matmul %112, %113, %cst_99 {dimension_numbers = #tpu.dot_dimension_numbers<[1], [0], [0], [1], [0, 0, 1, 1], [], []>} : vector<10x40xf32>, vector<40x16xf32>, vector<10x16xf32> -> vector<10x16xf32>
    %c0_100 = arith.constant 0 : index
    %c0_101 = arith.constant 0 : index
    %115 = vector.load %arg5[%c0_100, %c0_101] : memref<1x16xf32, #tpu.memory_space<vmem>>, vector<1x16xf32>
    %116 = vector.broadcast %115 : vector<1x16xf32> to vector<10x16xf32>
    %117 = arith.mulf %114, %116 : vector<10x16xf32>
    %c0_102 = arith.constant 0 : index
    %c0_103 = arith.constant 0 : index
    %118 = vector.load %arg6[%c0_102, %c0_103] : memref<1x16xf32, #tpu.memory_space<vmem>>, vector<1x16xf32>
    %119 = vector.broadcast %118 : vector<1x16xf32> to vector<10x16xf32>
    %120 = arith.addf %117, %119 : vector<10x16xf32>
    %cst_104 = arith.constant 0.000000e+00 : f32
    %121 = vector.broadcast %cst_104 : f32 to vector<10x16xf32>
    %122 = arith.maximumf %120, %121 : vector<10x16xf32>
    %123 = vector.extract_strided_slice %122 {offsets = [0, 0], sizes = [8, 16], strides = [1, 1]} : vector<10x16xf32> to vector<8x16xf32>
    %124 = vector.shape_cast %123 : vector<8x16xf32> to vector<2x4x16xf32>
    %cst_105 = arith.constant dense<0xFF800000> : vector<2x16xf32>
    %125 = vector.multi_reduction <maximumf>, %124, %cst_105 [1] : vector<2x4x16xf32> to vector<2x16xf32>
    %c1_106 = arith.constant 1 : index
    %c0_107 = arith.constant 0 : index
    %c0_108 = arith.constant 0 : index
    %126 = vector.load %arg7[%c1_106, %c0_107, %c0_108] : memref<2x2x16xf32, #tpu.memory_space<vmem>>, vector<1x2x16xf32>
    %127 = vector.shape_cast %126 : vector<1x2x16xf32> to vector<2x16xf32>
    %128 = vector.shape_cast %125 : vector<2x16xf32> to vector<1x2x16xf32>
    tpu.vector_store %arg7[%c1_106, %c0_107, %c0_108], %128 {strides = array<i32>} : memref<2x2x16xf32, #tpu.memory_space<vmem>>, vector<1x2x16xf32>,
    return
  }
}

</mosaic_0001>

<bundles_post_ra>
// kernel: tpu_custom_call.1
= control target key start
LH: loop header
LB: loop body
LE: loop exit
PB: predicated region body
PF: predicated region fallthrough
CT: control target
= control target key end

     0   :  { %s1624_s28 = smov 8   ;;  %s1625_s29 = smov 4   ;;  %s2647_s0 = inlined_call_operand.vmem [shape: f32[2,46,4], index: 0, kind: input, shape index: {}]   ;;  %s2648_s1 = inlined_call_operand.vmem [shape: f32[60,16], index: 1, kind: input, shape index: {}]   ;;  %s2649_s2 = inlined_call_operand.vmem [shape: f32[1,8], index: 2, kind: input, shape index: {}]   ;;  %s2650_s3 = inlined_call_operand.vmem [shape: f32[1,8], index: 3, kind: input, shape index: {}]   ;;  %s2651_s4 = inlined_call_operand.vmem [shape: f32[40,16], index: 4, kind: input, shape index: {}]   ;;  %s2652_s5 = inlined_call_operand.vmem [shape: f32[1,16], index: 5, kind: input, shape index: {}]   ;;  %s2653_s6 = inlined_call_operand.vmem [shape: f32[1,16], index: 6, kind: input, shape index: {}]   ;;  %s2654_s7 = inlined_call_operand.hbm [shape: f32[2,2,16], index: 7, kind: output, shape index: {}]  }
   0x1   :  { %v35_v0 = vld [vmem:[%s2647_s0 + $0x2] sm:$0xff]  ;;  %v36_v2 = vld [vmem:[%s2647_s0 + $0xa] sm:$0xff]  ;;  %s1626_s15 = smov 12   ;;  %s1627_s20 = smov 16   ;;  %v37_v10 = vld [vmem:[%s2647_s0 + $0x12] sm:$0xff] }
   0x2   :  { %v31_v1 = vld [vmem:[%s2647_s0 + $0x1] sm:$0xff]  ;;  %86 = vrot.lane.b32.xlu1 %v35_v0, %s1624_s28  ;;  %v32_v3 = vld [vmem:[%s2647_s0 + $0x9] sm:$0xff]  ;;  %v33_v6 = vld [vmem:[%s2647_s0 + $0x11] sm:$0xff]  ;;  %s1628_s25 = smov 20  }
   0x3   :  { %70 = vrot.lane.b32.xlu0 %v31_v1, %s1625_s29  ;;  %v1701_v4 = vld [vmem:[%s2647_s0 + $0xb] sm:$0xff]  ;;  %v39_v5 = vld [vmem:[%s2647_s0 + $0x3] sm:$0xff]  ;;  %v1734_v11 = vld [vmem:[%s2647_s0 + $0x19] sm:$0xff] }
   0x4   :  { %v43_v7 = vld [vmem:[%s2647_s0 + $0x4] sm:$0xff]  ;;  %v1723_v9 = vld [vmem:[%s2647_s0 + $0xc] sm:$0xff] }
   0x5   :  { %v47_v8 = vld [vmem:[%s2647_s0 + $0x5] sm:$0xff]  ;;  %v1745_v13 = vld [vmem:[%s2647_s0 + $0xd] sm:$0xff] }
   0x6   :  { %88 = vrot.lane.b32.xlu1 %v36_v2, %s1624_s28  ;;  %v51_v12 = vld [vmem:[%s2647_s0 + $0x6] sm:$0xff] }
   0x7   :  { %72 = vrot.lane.b32.xlu0 %v32_v3, %s1625_s29 }
   0xa   :  { %104 = vrot.lane.b32.xlu1 %v1701_v4, %s1626_s15 }
   0xb   :  { %102 = vrot.lane.b32.xlu0 %v39_v5, %s1626_s15 }
   0xe   :  { %74 = vrot.lane.b32.xlu1 %v33_v6, %s1625_s29 }
   0xf   :  { %118 = vrot.lane.b32.xlu0 %v43_v7, %s1627_s20 }
  0x12   :  { %134 = vrot.lane.b32.xlu1 %v47_v8, %s1628_s25 }
  0x13   :  { %120 = vrot.lane.b32.xlu0 %v1723_v9, %s1627_s20 }
  0x16   :  { %90 = vrot.lane.b32.xlu1 %v37_v10, %s1624_s28 }
  0x17   :  { %76 = vrot.lane.b32.xlu0 %v1734_v11, %s1625_s29 }
  0x18   :  { %12 = vsyncpa [#allocation3], 0  ;;  %s1629_s13 = smov 24   ;;  %v41_v14 = vld [vmem:[%s2647_s0 + $0x13] sm:$0xff]  ;;  %v55_v16 = vld [vmem:[%s2647_s0 + $0x7] sm:$0xff]  ;;  %s1630_s24 = smov 28  }
  0x19   :  { %v1756_v15 = vld [vmem:[%s2647_s0 + $0x1a] sm:$0xff]  ;;  %v1767_v17 = vld [vmem:[%s2647_s0 + $0xe] sm:$0xff]  ;;  %s1631_s14 = smov 32   ;;  %s1632_s23 = smov 36   ;;  %vm677_vm0 = vcmask 1043456   ;;  %vm1637_vm1 = vmmov 1  }
  0x1a   :  { %150 = vrot.lane.b32.xlu1 %v51_v12, %s1629_s13  ;;  %v45_v18 = vld [vmem:[%s2647_s0 + $0x14] sm:$0xff]  ;;  %v1789_v21 = vld [vmem:[%s2647_s0 + $0x8] sm:$0xff]  ;;  %v1797_v22 = vld [vmem:[%s2647_s0 + $0x1c] sm:$0xff]  ;;  %s1633_s9 = smov 40   ;;  %s1634_s22 = smov 44   ;;  %vm272_vm3 = vcmask 31744  }
  0x1b   :  { %136 = vrot.lane.b32.xlu0 %v1745_v13, %s1628_s25  ;;  %v1778_v19 = vld [vmem:[%s2647_s0 + $0x1b] sm:$0xff]  ;;  %v56_v20 = vld [vmem:[%s2647_s0 + $0xf] sm:$0xff]  ;;  %s1635_s17 = smov 48   ;;  %s1636_s26 = smov 52   ;;  %vm1561_vm2 = vmpackc.low %vm677_vm0, %vm1637_vm1  ;;  %vm277_vm4 = vcmask 64512   ;;  %vm282_vm5 = vcmask 97280  }
  0x1c   :  { %v1802_v23 = vld [vmem:[%s2647_s0 + $0x15] sm:$0xff]  ;;  %v1819_v25 = vld [vmem:[%s2647_s0 + $0x1d] sm:$0xff]  ;;  %v645_v38 = vld [vmem:[%s2648_s1 + $0x8] sm:$0xff]  ;;  %s1638_s11 = smov 56   ;;  %vm287_vm6 = vcmask 130048   ;;  %vm292_vm7 = vcmask 162816  }
  0x1d   :  { %v1811_v24 = vld [vmem:[%s2647_s0 + $0x10] sm:$0xff]  ;;  %v1838_v28 = vld [vmem:[%s2647_s0 + $0x1e] sm:$0xff]  ;;  %v649_v47 = vld [vmem:[%s2648_s1 + $0x28] sm:$0xff]  ;;  %vm297_vm8 = vcmask 195584   ;;  %vm302_vm9 = vcmask 228352   ;;  %vm307_vm10 = vcmask 261120  }
  0x1e   :  { %106 = vrot.lane.b32.xlu1 %v41_v14, %s1626_s15  ;;  %v1824_v26 = vld [vmem:[%s2647_s0 + $0x16] sm:$0xff]  ;;  %v58_v32 = vld [vmem:[%s2647_s0 + $0x1f] sm:$0xff]  ;;  %v1968_v56 = vld [vmem:[%s2647_s0 + $0x49] sm:$0xff]  ;;  %vm312_vm11 = vcmask 293888   ;;  %vm2655_vm12 = vcmask 326656   ;;  %vm322_vm13 = vcmask 359424  }
  0x1f   :  { %92 = vrot.lane.b32.xlu0 %v1756_v15, %s1624_s28  ;;  %v1410_v27 = vld [vmem:[%s2647_s0 + $0x31] sm:$0xff]  ;;  %v1851_v30 = vld [vmem:[%s2647_s0 + $0x39] sm:$0xff]  ;;  %v60_v45 = vld [vmem:[%s2647_s0 + $0x21] sm:$0xff]  ;;  %vm327_vm14 = vcmask 392192   ;;  %vm332_vm15 = vcmask 424960   ;;  %vm337_vm1 = vcmask 457728  }
  0x20   :  { %v57_v29 = vld [vmem:[%s2647_s0 + $0x17] sm:$0xff]  ;;  %v59_v36 = vld [vmem:[%s2647_s0 + $0x20] sm:$0xff] }
  0x21   :  { %v1414_v31 = vld [vmem:[%s2647_s0 + $0x32] sm:$0xff]  ;;  %v1876_v34 = vld [vmem:[%s2647_s0 + $0x3a] sm:$0xff]  ;;  %v61_v55 = vld [vmem:[%s2647_s0 + $0x22] sm:$0xff] }
  0x22   :  { %166 = vrot.lane.b32.xlu1 %v55_v16, %s1630_s24  ;;  %v1868_v33 = vld [vmem:[%s2647_s0 + $0x18] sm:$0xff]  ;;  %v644_v37 = vld [vmem:[%s2648_s1] sm:$0xff]  ;;  %v646_v41 = vld [vmem:[%s2648_s1 + $0x10] sm:$0xff] }
  0x23   :  { %152 = vrot.lane.b32.xlu0 %v1767_v17, %s1629_s13  ;;  %v1418_v35 = vld [vmem:[%s2647_s0 + $0x33] sm:$0xff]  ;;  %v1548_v39 = vpack.c.bf16 %v645_v38, %v644_v37  ;;  %v1902_v40 = vld [vmem:[%s2647_s0 + $0x3b] sm:$0xff]  ;;  %v62_v0 = vld [vmem:[%s2647_s0 + $0x23] sm:$0xff] }
  0x24   :  { %v647_v42 = vld [vmem:[%s2648_s1 + $0x18] sm:$0xff]  ;;  %v648_v46 = vld [vmem:[%s2648_s1 + $0x20] sm:$0xff]  ;;  %v650_v49 = vld [vmem:[%s2648_s1 + $0x30] sm:$0xff] }
  0x25   :  { %1549 = vmatprep.subr.bf16.mxu0 %v1548_v39  ;;  %v1552_v43 = vpack.c.bf16 %v647_v42, %v646_v41  ;;  %v1422_v44 = vld [vmem:[%s2647_s0 + $0x34] sm:$0xff]  ;;  %v1556_v48 = vpack.c.bf16 %v649_v47, %v648_v46  ;;  %v1942_v52 = vld [vmem:[%s2647_s0 + $0x41] sm:$0xff] }
  0x26   :  { %122 = vrot.lane.b32.xlu1 %v45_v18, %s1627_s20  ;;  %1551 = vmatpush3.bf16.msra.mxu0 %v1548_v39  ;;  %v651_v50 = vld [vmem:[%s2648_s1 + $0x38] sm:$0xf]  ;;  %v1951_v53 = vld [vmem:[%s2647_s0 + $0x3c] sm:$0xff]  ;;  %v2134_v41 = vld [vmem:[%s2647_s0 + $0x4d] sm:$0xff] }
  0x27   :  { %108 = vrot.lane.b32.xlu0 %v1778_v19, %s1626_s15  ;;  %1553 = vmatprep.subr.bf16.mxu0 %v1552_v43  ;;  %v1560_v51 = vpack.c.bf16 %v651_v50, %v650_v49  ;;  %v1426_v54 = vld [vmem:[%s2647_s0 + $0x35] sm:$0xff]  ;;  %v1981_v59 = vld [vmem:[%s2647_s0 + $0x42] sm:$0xff] }
  0x28   :  { %v1986_v60 = vld [vmem:[%s2647_s0 + $0x3d] sm:$0xff]  ;;  %v2139_v42 = vld [vmem:[%s2647_s0 + $0x46] sm:$0xff]  ;;  %v2158_v46 = vld [vmem:[%s2647_s0 + $0x4e] sm:$0xff] }
  0x29   :  { %v1430_v63 = vld [vmem:[%s2647_s0 + $0x36] sm:$0xff]  ;;  %v2029_v7 = vld [vmem:[%s2647_s0 + $0x3e] sm:$0xff]  ;;  %v1436_v47 = vld [vmem:[%s2647_s0 + $0x47] sm:$0xff] }
  0x2a   :  { %182 = vrot.lane.b32.xlu1 %v1789_v21, %s1631_s14  ;;  %1555 = vmatpush3.bf16.msra.mxu0 %v1552_v43 }
  0x2b   :  { %168 = vrot.lane.b32.xlu0 %v56_v20, %s1630_s24  ;;  %1557 = vmatprep.subr.bf16.mxu0 %v1556_v48 }
  0x2e   :  { %138 = vrot.lane.b32.xlu1 %v1802_v23, %s1628_s25  ;;  %1559 = vmatpush3.bf16.msra.mxu0 %v1556_v48 }
  0x2f   :  { %124 = vrot.lane.b32.xlu0 %v1797_v22, %s1627_s20  ;;  %1562 = vmatprep.subr.msk.bf16.mxu0 %vm1561_vm2, %v1560_v51 }
  0x32   :  { %195 = vrot.lane.b32.xlu1 %v32_v3, %s1632_s23  ;;  %1565 = vmatpush3.bf16.msk.msra.mxu0 %vm1561_vm2, %v1560_v51  ;;  %v2011_v3 = vld [vmem:[%s2647_s0 + $0x4a] sm:$0xff]  ;;  %vm652_vm2 = vcmask 490496  }
  0x33   :  { %184 = vrot.lane.b32.xlu0 %v1811_v24, %s1631_s14  ;;  %v1437_v51 = vld [vmem:[%s2647_s0 + $0x4f] sm:$0xff] }
  0x36   :  { %154 = vrot.lane.b32.xlu1 %v1824_v26, %s1629_s13 }
  0x37   :  { %140 = vrot.lane.b32.xlu0 %v1819_v25, %s1628_s25 }
  0x3a   :  { %208 = vrot.lane.b32.xlu1 %v36_v2, %s1633_s9 }
  0x3b   :  { %197 = vrot.lane.b32.xlu0 %v33_v6, %s1632_s23  ;;  %v2024_v6 = vld [vmem:[%s2647_s0 + $0x43] sm:$0xff] }
  0x3e   :  { %156 = vrot.lane.b32.xlu1 %v1838_v28, %s1629_s13 }
  0x3f   :  { %386 = vrot.lane.b32.xlu0 %v1410_v27, %s1625_s29  ;;  %v2097_v27 = vld [vmem:[%s2647_s0 + $0x4c] sm:$0xff] }
  0x42   :  { %210 = vrot.lane.b32.xlu1 %v37_v10, %s1633_s9  ;;  %v1434_v10 = vld [vmem:[%s2647_s0 + $0x37] sm:$0xff] }
  0x43   :  { %170 = vrot.lane.b32.xlu0 %v57_v29, %s1630_s24 }
  0x46   :  { %388 = vrot.lane.b32.xlu1 %v1851_v30, %s1625_s29 }
  0x47   :  { %221 = vrot.lane.b32.xlu0 %v1701_v4, %s1634_s22 }
  0x4a   :  { %172 = vrot.lane.b32.xlu1 %v58_v32, %s1630_s24  ;;  %v2108_v32 = vld [vmem:[%s2647_s0 + $0x45] sm:$0xff] }
  0x4b   :  { %402 = vrot.lane.b32.xlu0 %v1414_v31, %s1624_s28 }
  0x4e   :  { %223 = vrot.lane.b32.xlu1 %v41_v14, %s1634_s22  ;;  %v2054_v14 = vld [vmem:[%s2647_s0 + $0x4b] sm:$0xff] }
  0x4f   :  { %186 = vrot.lane.b32.xlu0 %v1868_v33, %s1631_s14 }
  0x52   :  { %404 = vrot.lane.b32.xlu1 %v1876_v34, %s1624_s28 }
  0x53   :  { %234 = vrot.lane.b32.xlu0 %v1723_v9, %s1635_s17 }
  0x56   :  { %188 = vrot.lane.b32.xlu1 %v59_v36, %s1631_s14 }
  0x57   :  { %418 = vrot.lane.b32.xlu0 %v1418_v35, %s1626_s15  ;;  %v2113_v35 = vld [vmem:[%s2647_s0 + $0x40] sm:$0xff] }
  0x5a   :  { %236 = vrot.lane.b32.xlu1 %v45_v18, %s1635_s17  ;;  %v1435_v18 = vld [vmem:[%s2647_s0 + $0x3f] sm:$0xff] }
  0x5b   :  { %199 = vrot.lane.b32.xlu0 %v1734_v11, %s1632_s23  ;;  %v63_v11 = vld [vmem:[%s2647_s0 + $0x24] sm:$0xff] }
  0x5e   :  { %420 = vrot.lane.b32.xlu1 %v1902_v40, %s1626_s15 }
  0x5f   :  { %247 = vrot.lane.b32.xlu0 %v1745_v13, %s1636_s26 }
  0x62   :  { %201 = vrot.lane.b32.xlu1 %v60_v45, %s1632_s23 }
  0x63   :  { %434 = vrot.lane.b32.xlu0 %v1422_v44, %s1627_s20 }
  0x66   :  { %249 = vrot.lane.b32.xlu1 %v1802_v23, %s1636_s26  ;;  %v64_v23 = vld [vmem:[%s2647_s0 + $0x25] sm:$0xff] }
  0x67   :  { %212 = vrot.lane.b32.xlu0 %v1756_v15, %s1633_s9 }
  0x6a   :  { %390 = vrot.lane.b32.xlu1 %v1942_v52, %s1625_s29 }
  0x6b   :  { %260 = vrot.lane.b32.xlu0 %v1767_v17, %s1638_s11  ;;  %v2067_v17 = vld [vmem:[%s2647_s0 + $0x44] sm:$0xff] }
  0x6e   :  { %450 = vrot.lane.b32.xlu1 %v1426_v54, %s1628_s25 }
  0x6f   :  { %436 = vrot.lane.b32.xlu0 %v1951_v53, %s1627_s20 }
  0x72   :  { %225 = vrot.lane.b32.xlu1 %v1778_v19, %s1634_s22 }
  0x73   :  { %214 = vrot.lane.b32.xlu0 %v61_v55, %s1633_s9 }
  0x74   :  { %v1970_v57 = vpop.permute.xlu1 %86 }
  0x75   :  { %v1972_v58 = vpop.permute.xlu0 %70 }
  0x76   :  { %392 = vrot.lane.b32.xlu1 %v1968_v56, %s1625_s29 }
  0x77   :  { %262 = vrot.lane.b32.xlu0 %v1824_v26, %s1638_s11 }
  0x78   :  { %v1988_v61 = vpop.permute.xlu1 %88 }
  0x79   :  { %v1990_v62 = vpop.permute.xlu0 %72 }
  0x7a   :  { %452 = vrot.lane.b32.xlu1 %v1986_v60, %s1628_s25 }
  0x7b   :  { %406 = vrot.lane.b32.xlu0 %v1981_v59, %s1624_s28 }
  0x7c   :  { %v2002_v1 = vpop.permute.xlu1 %104 }
  0x7d   :  { %v2004_v2 = vpop.permute.xlu0 %102 }
  0x7e   :  { %227 = vrot.lane.b32.xlu1 %v62_v0, %s1634_s22 }
  0x7f   :  { %466 = vrot.lane.b32.xlu0 %v1430_v63, %s1629_s13  ;;  %v1438_v63 = vld [vmem:[%s2647_s0 + $0x50] sm:$0xff] }
  0x80   :  { %v2013_v4 = vpop.permute.xlu1 %74 }
  0x81   :  { %v2015_v5 = vpop.permute.xlu0 %118 }
  0x82   :  { %408 = vrot.lane.b32.xlu1 %v2011_v3, %s1624_s28 }
  0x83   :  { %238 = vrot.lane.b32.xlu0 %v1797_v22, %s1635_s17  ;;  %v2082_v22 = vld [vmem:[%s2647_s0 + $0x38] sm:$0xff] }
  0x84   :  { %v2031_v8 = vpop.permute.xlu1 %134 }
  0x85   :  { %v2033_v9 = vpop.permute.xlu0 %120 }
  0x86   :  { %468 = vrot.lane.b32.xlu1 %v2029_v7, %s1629_s13 }
  0x87   :  { %422 = vrot.lane.b32.xlu0 %v2024_v6, %s1626_s15 }
  0x88   :  { %v2045_v12 = vpop.permute.xlu1 %90 }
  0x89   :  { %v2047_v13 = vpop.permute.xlu0 %76 }
  0x8a   :  { %240 = vrot.lane.b32.xlu1 %v63_v11, %s1635_s17 }
  0x8b   :  { %482 = vrot.lane.b32.xlu0 %v1434_v10, %s1630_s24 }
  0x8c   :  { %v2056_v15 = vpop.permute.xlu1 %150 }
  0x8d   :  { %v2058_v16 = vpop.permute.xlu0 %136 }
  0x8e   :  { %424 = vrot.lane.b32.xlu1 %v2054_v14, %s1626_s15 }
  0x8f   :  { %251 = vrot.lane.b32.xlu0 %v1819_v25, %s1636_s26 }
  0x90   :  { %v2072_v19 = vpop.permute.xlu1 %106 }
  0x91   :  { %v2074_v20 = vpop.permute.xlu0 %92 }
  0x92   :  { %484 = vrot.lane.b32.xlu1 %v1435_v18, %s1630_s24 }
  0x93   :  { %438 = vrot.lane.b32.xlu0 %v2067_v17, %s1627_s20 }
  0x94   :  { %v2087_v25 = vpop.permute.xlu1 %166 }
  0x95   :  { %v2089_v26 = vpop.permute.xlu0 %152 }
  0x96   :  { %253 = vrot.lane.b32.xlu1 %v64_v23, %s1636_s26 }
  0x97   :  { %498 = vrot.lane.b32.xlu0 %v2082_v22, %s1631_s14 }
  0x98   :  { %v2099_v29 = vpop.permute.xlu1 %122 }
  0x99   :  { %v109_v31 = vpop.permute.xlu0 %108 }
  0x9a   :  { %440 = vrot.lane.b32.xlu1 %v2097_v27, %s1627_s20 }
  0x9b   :  { %264 = vrot.lane.b32.xlu0 %v1838_v28, %s1638_s11  ;;  %v65_v28 = vld [vmem:[%s2647_s0 + $0x26] sm:$0xff] }
  0x9c   :  { %v2117_v37 = vpop.permute.xlu1 %182 }
  0x9d   :  { %v2115_v36 = vpop.permute.xlu0 %168 }
  0x9e   :  { %500 = vrot.lane.b32.xlu1 %v2113_v35, %s1631_s14 }
  0x9f   :  { %454 = vrot.lane.b32.xlu0 %v2108_v32, %s1628_s25 }
  0xa0   :  { %v2126_v39 = vpop.permute.xlu1 %138 }
  0xa1   :  { %v125_v38 = vpop.permute.xlu0 %124 }
  0xa2   :  { %266 = vrot.lane.b32.xlu1 %v65_v28, %s1638_s11 }
  0xa3   :  { %511 = vrot.lane.b32.xlu0 %v1851_v30, %s1632_s23 }
  0xa4   :  { %v2143_v44 = vpop.permute.xlu1 %195 }
  0xa5   :  { %v2141_v43 = vpop.permute.xlu0 %184 }
  0xa6   :  { %470 = vrot.lane.b32.xlu1 %v2139_v42, %s1629_s13 }
  0xa7   :  { %456 = vrot.lane.b32.xlu0 %v2134_v41, %s1628_s25 }
  0xa8   :  { %v2149_v45 = vpop.permute.xlu1 %154 }
  0xa9   :  { %v141_v30 = vpop.permute.xlu0 %140 }
  0xaa   :  { %524 = vrot.lane.b32.xlu1 %v1876_v34, %s1633_s9 }
  0xab   :  { %513 = vrot.lane.b32.xlu0 %v1942_v52, %s1632_s23  ;;  %v2182_v52 = vld [vmem:[%s2647_s0 + $0x48] sm:$0xff] }
  0xac   :  { %v2165_v49 = vpop.permute.xlu1 %208 }
  0xad   :  { %v2163_v48 = vpop.permute.xlu0 %197 }
  0xae   :  { %486 = vrot.lane.b32.xlu1 %v1436_v47, %s1630_s24 }
  0xaf   :  { %472 = vrot.lane.b32.xlu0 %v2158_v46, %s1629_s13 }
  0xb0   :  { %v157_v34 = vpop.permute.xlu1 %156 }
  0xb1   :  { %v2170_v50 = vpop.permute.xlu0 %386 }
  0xb2   :  { %537 = vrot.lane.b32.xlu1 %v1902_v40, %s1634_s22 }
  0xb3   :  { %526 = vrot.lane.b32.xlu0 %v1981_v59, %s1633_s9 }
  0xb4   :  { %v2186_v55 = vpop.permute.xlu1 %210 }
  0xb5   :  { %v2184_v54 = vpop.permute.xlu0 %170 }
  0xb6   :  { %502 = vrot.lane.b32.xlu1 %v2182_v52, %s1631_s14 }
  0xb7   :  { %488 = vrot.lane.b32.xlu0 %v1437_v51, %s1630_s24 }
  0xb8   :  { %v389_v40 = vpop.permute.xlu1 %388 }
  0xb9   :  { %v2191_v59 = vpop.permute.xlu0 %221 }
  0xba   :  { %550 = vrot.lane.b32.xlu1 %v1951_v53, %s1635_s17  ;;  %v276_v53 = vsel %vm272_vm3, %v1868_v33, %v2047_v13  ;;  %v589_v33 = vsel %vm272_vm3, %v2082_v22, %v389_v40 }
  0xbb   :  { %539 = vrot.lane.b32.xlu0 %v2024_v6, %s1634_s22  ;;  %v1439_v6 = vld [vmem:[%s2647_s0 + $0x51] sm:$0xff] }
  0xbc   :  { %v173_v10 = vpop.permute.xlu1 %172 }
  0xbd   :  { %v403_v0 = vpop.permute.xlu0 %402 }
  0xbe   :  { %515 = vrot.lane.b32.xlu1 %v1968_v56, %s1632_s23  ;;  %v281_v56 = vsel %vm277_vm4, %v276_v53, %v2074_v20 }
  0xbf   :  { %504 = vrot.lane.b32.xlu0 %v1438_v63, %s1631_s14  ;;  %v286_v23 = vsel %vm282_vm5, %v281_v56, %v109_v31 }
  0xc0   :  { %v2205_v18 = vpop.permute.xlu1 %223 }
  0xc1   :  { %v2203_v11 = vpop.permute.xlu0 %186 }
  0xc2   :  { %563 = vrot.lane.b32.xlu1 %v1986_v60, %s1636_s26  ;;  %v291_v60 = vsel %vm287_vm6, %v286_v23, %v125_v38 }
  0xc3   :  { %552 = vrot.lane.b32.xlu0 %v2067_v17, %s1635_s17  ;;  %v296_v20 = vsel %vm292_vm7, %v291_v60, %v141_v30  ;;  %v1440_v30 = vld [vmem:[%s2647_s0 + $0x52] sm:$0xff] }
  0xc4   :  { %v405_v17 = vpop.permute.xlu1 %404  ;;  %v301_v31 = vsel %vm297_vm8, %v296_v20, %v157_v34 }
  0xc5   :  { %v2222_v13 = vpop.permute.xlu0 %234  ;;  %v593_v28 = vsel %vm277_vm4, %v589_v33, %v405_v17  ;;  %v306_v22 = vsel %vm302_vm9, %v301_v31, %v173_v10 }
  0xc6   :  { %528 = vrot.lane.b32.xlu1 %v2011_v3, %s1633_s9  ;;  %v27_v3 = vld [vmem:[%s2647_s0] sm:$0xff] }
  0xc7   :  { %517 = vrot.lane.b32.xlu0 %v1439_v6, %s1632_s23  ;;  %v273_v63 = vsel %vm272_vm3, %v27_v3, %v1972_v58 }
  0xc8   :  { %v189_v51 = vpop.permute.xlu1 %188  ;;  %v278_v56 = vsel %vm277_vm4, %v273_v63, %v1970_v57  ;;  %v1442_v57 = vld [vmem:[%s2647_s0 + $0x54] sm:$0xff] }
  0xc9   :  { %v419_v47 = vpop.permute.xlu0 %418  ;;  %v2233_v38 = vsel %vm307_vm10, %v306_v22, %v189_v51  ;;  %v283_v6 = vsel %vm282_vm5, %v278_v56, %v2004_v2 }
  0xca   :  { %576 = vrot.lane.b32.xlu1 %v2029_v7, %s1638_s11  ;;  %v1406_v7 = vld [vmem:[%s2647_s0 + $0x30] sm:$0xff]  ;;  %v288_v23 = vsel %vm287_vm6, %v283_v6, %v2015_v5 }
  0xcb   :  { %565 = vrot.lane.b32.xlu0 %v2108_v32, %s1636_s26  ;;  %v1441_v32 = vld [vmem:[%s2647_s0 + $0x53] sm:$0xff]  ;;  %v293_v2 = vsel %vm292_vm7, %v288_v23, %v2031_v8 }
  0xcc   :  { %v2247_v40 = vpop.permute.xlu1 %236 }
  0xcd   :  { %v2245_v34 = vpop.permute.xlu0 %199 }
  0xce   :  { %541 = vrot.lane.b32.xlu1 %v2054_v14, %s1634_s22  ;;  %v588_v14 = vsel %vm272_vm3, %v1406_v7, %v2170_v50 }
  0xcf   :  { %530 = vrot.lane.b32.xlu0 %v1440_v30, %s1633_s9  ;;  %v592_v33 = vsel %vm277_vm4, %v588_v14, %v403_v0 }
  0xd0   :  { %v421_v53 = vpop.permute.xlu1 %420  ;;  %v596_v17 = vsel %vm282_vm5, %v592_v33, %v419_v47 }
  0xd1   :  { %v248_v10 = vpop.permute.xlu0 %247  ;;  %v597_v58 = vsel %vm282_vm5, %v593_v28, %v421_v53 }
  0xd2   :  { %543 = vrot.lane.b32.xlu1 %v1441_v32, %s1634_s22 }
  0xd3   :  { %578 = vrot.lane.b32.xlu0 %v2139_v42, %s1638_s11  ;;  %v298_v42 = vsel %vm297_vm8, %v293_v2, %v2056_v15  ;;  %v1443_v15 = vld [vmem:[%s2647_s0 + $0x55] sm:$0xff] }
  0xd4   :  { %v2279_v60 = vpop.permute.xlu1 %201  ;;  %v303_v0 = vsel %vm302_vm9, %v298_v42, %v2087_v25 }
  0xd5   :  { %v435_v50 = vpop.permute.xlu0 %434  ;;  %v308_v8 = vsel %vm307_vm10, %v303_v0, %v2117_v37  ;;  %v274_v37 = vsel %vm272_vm3, %v1789_v21, %v1990_v62 }
  0xd6   :  { %v600_v5 = vsel %vm287_vm6, %v596_v17, %v435_v50  ;;  %556 = vrot.lane.b32.xlu1 %v1442_v57, %s1635_s17  ;;  %v313_v28 = vsel %vm312_vm11, %v308_v8, %v2143_v44  ;;  %v279_v62 = vsel %vm277_vm4, %v274_v37, %v1988_v61 }
  0xd7   :  { %554 = vrot.lane.b32.xlu0 %v2097_v27, %s1635_s17  ;;  %v318_v27 = vsel %vm2655_vm12, %v313_v28, %v2165_v49  ;;  %v1444_v49 = vld [vmem:[%s2647_s0 + $0x56] sm:$0xff]  ;;  %s1639_s0 = smov 120  }
  0xd8   :  { %v250_v25 = vpop.permute.xlu1 %249  ;;  %v323_v31 = vsel %vm322_vm13, %v318_v27, %v2191_v59 }
  0xd9   :  { %v2296_v20 = vpop.permute.xlu0 %212  ;;  %v328_v44 = vsel %vm327_vm14, %v323_v31, %v2222_v13  ;;  %v284_v13 = vsel %vm282_vm5, %v279_v62, %v2002_v1 }
  0xda   :  { %569 = vrot.lane.b32.xlu1 %v1443_v15, %s1636_s26  ;;  %v333_v22 = vsel %vm332_vm15, %v328_v44, %v248_v10  ;;  %v289_v51 = vsel %vm287_vm6, %v284_v13, %v2033_v9  ;;  %v275_v15 = vsel %vm272_vm3, %v1811_v24, %v2013_v4 }
  0xdb   :  { %567 = vrot.lane.b32.xlu0 %v2134_v41, %s1636_s26  ;;  %v294_v61 = vsel %vm292_vm7, %v289_v51, %v2058_v16  ;;  %v280_v27 = vsel %vm277_vm4, %v275_v15, %v2045_v12 }
  0xdc   :  { %v391_v21 = vpop.permute.xlu1 %390  ;;  %v299_v30 = vsel %vm297_vm8, %v294_v61, %v2089_v26  ;;  %v285_v31 = vsel %vm282_vm5, %v280_v27, %v2072_v19 }
  0xdd   :  { %v261_v47 = vpop.permute.xlu0 %260  ;;  %v590_v41 = vsel %vm272_vm3, %v2113_v35, %v391_v21  ;;  %v290_v44 = vsel %vm287_vm6, %v285_v31, %v2099_v29 }
  0xde   :  { %v338_v59 = vsel %vm337_vm1, %v333_v22, %v261_v47  ;;  %582 = vrot.lane.b32.xlu1 %v1444_v49, %s1638_s11  ;;  %v295_v49 = vsel %vm292_vm7, %v290_v44, %v2126_v39 }
  0xdf   :  { %580 = vrot.lane.b32.xlu0 %v2158_v46, %s1638_s11  ;;  %1510 = vmatprep.mubr.msk.f32.mxu0 %vm652_vm2, %v338_v59  ;;  %v304_v46 = vsel %vm302_vm9, %v299_v30, %v2115_v36  ;;  %v300_v24 = vsel %vm297_vm8, %v295_v49, %v2149_v45 }
  0xe0   :  { %v451_v35 = vpop.permute.xlu1 %450  ;;  %v309_v9 = vsel %vm307_vm10, %v304_v46, %v2141_v43  ;;  %v305_v12 = vsel %vm302_vm9, %v300_v24, %v2184_v54 }
  0xe1   :  { %v437_v3 = vpop.permute.xlu0 %436  ;;  %v604_v63 = vsel %vm292_vm7, %v600_v5, %v451_v35  ;;  %v314_v7 = vsel %vm312_vm11, %v309_v9, %v2163_v48  ;;  %v310_v19 = vsel %vm307_vm10, %v305_v12, %v2203_v11  ;;  %v316_v11 = vsel %vm312_vm11, %v2233_v38, %v2279_v60 }
  0xe2   :  { %v601_v1 = vsel %vm287_vm6, %v597_v58, %v437_v3  ;;  %v319_v10 = vsel %vm2655_vm12, %v314_v7, %v2186_v55  ;;  %v315_v29 = vsel %vm312_vm11, %v310_v19, %v2245_v34 }
  0xe3   :  { %v324_v26 = vsel %vm322_vm13, %v319_v10, %v2205_v18  ;;  %v320_v39 = vsel %vm2655_vm12, %v315_v29, %v2296_v20 }
  0xe4   :  { %v226_v16 = vpop.permute.xlu1 %225  ;;  %v329_v53 = vsel %vm327_vm14, %v324_v26, %v2247_v40 }
  0xe5   :  { %v215_v32 = vpop.permute.xlu0 %214  ;;  %v334_v56 = vsel %vm332_vm15, %v329_v53, %v250_v25 }
  0xe6   :  { %v321_v20 = vsel %vm2655_vm12, %v316_v11, %v215_v32 }
  0xe8   :  { %v393_v58 = vpop.permute.xlu1 %392 }
  0xe9   :  { %v263_v36 = vpop.permute.xlu0 %262  ;;  %v591_v48 = vsel %vm272_vm3, %v2182_v52, %v393_v58  ;;  %vm876_vm3 = vcmask 60416  }
  0xea   :  { %v339_v43 = vsel %vm337_vm1, %v334_v56, %v263_v36 }
  0xeb   :  { %1511 = vmatmul.mubr.msk.f32.vlgmr.msra.gmra.mrb[0].mxu0 %vm652_vm2, %v339_v43 }
  0xec   :  { %v453_v14 = vpop.permute.xlu1 %452 }
  0xed   :  { %v407_v6 = vpop.permute.xlu0 %406  ;;  %v605_v18 = vsel %vm292_vm7, %v601_v1, %v453_v14 }
  0xee   :  { %v594_v55 = vsel %vm277_vm4, %v590_v41, %v407_v6  ;;  %v325_v41 = vsel %vm322_vm13, %v320_v39, %v226_v16 }
  0xf0   :  { %v228_v33 = vpop.permute.xlu1 %227 }
  0xf1   :  { %v467_v23 = vpop.permute.xlu0 %466  ;;  %v326_v3 = vsel %vm322_vm13, %v321_v20, %v228_v33 }
  0xf2   :  { %v2353_v40 = vsel %vm297_vm8, %v604_v63, %v467_v23 }
  0xf4   :  { %v409_v2 = vpop.permute.xlu1 %408 }
  0xf5   :  { %v239_v57 = vpop.permute.xlu0 %238  ;;  %v595_v17 = vsel %vm277_vm4, %v591_v48, %v409_v2 }
  0xf6   :  { %v330_v45 = vsel %vm327_vm14, %v325_v41, %v239_v57 }
  0xf8   :  { %v469_v42 = vpop.permute.xlu1 %468 }
  0xf9   :  { %v423_v50 = vpop.permute.xlu0 %422  ;;  %v2358_v5 = vsel %vm297_vm8, %v605_v18, %v469_v42 }
  0xfa   :  { %v598_v52 = vsel %vm282_vm5, %v594_v55, %v423_v50 }
  0xfc   :  { %v241_v8 = vpop.permute.xlu1 %240 }
  0xfd   :  { %v483_v0 = vpop.permute.xlu0 %482  ;;  %v331_v35 = vsel %vm327_vm14, %v326_v3, %v241_v8 }
  0xfe   :  { %v612_v55 = vsel %vm302_vm9, %v2353_v40, %v483_v0 }
 0x100   :  { %v425_v25 = vpop.permute.xlu1 %424 }
 0x101   :  { %v252_v28 = vpop.permute.xlu0 %251  ;;  %v2366_v37 = vsel %vm282_vm5, %v595_v17, %v425_v25  ;;  %vm941_vm5 = vcmask 1044484  }
 0x102   :  { %v335_v59 = vsel %vm332_vm15, %v330_v45, %v252_v28 }
 0x104   :  { %v485_v47 = vpop.permute.xlu1 %484 }
 0x105   :  { %v439_v22 = vpop.permute.xlu0 %438  ;;  %v613_v40 = vsel %vm302_vm9, %v2358_v5, %v485_v47 }
 0x106   :  { %v2377_v4 = vsel %vm287_vm6, %v598_v52, %v439_v22 }
 0x108   :  { %v254_v62 = vpop.permute.xlu1 %253 }
 0x109   :  { %v499_v21 = vpop.permute.xlu0 %498  ;;  %v336_v30 = vsel %vm332_vm15, %v331_v35, %v254_v62 }
 0x10a   :  { %v616_v18 = vsel %vm307_vm10, %v612_v55, %v499_v21 }
 0x10c   :  { %v441_v51 = vpop.permute.xlu1 %440 }
 0x10d   :  { %v265_v13 = vpop.permute.xlu0 %264  ;;  %v603_v47 = vsel %vm287_vm6, %v2366_v37, %v441_v51 }
 0x10e   :  { %v340_v54 = vsel %vm337_vm1, %v335_v59, %v265_v13 }
 0x10f   :  { %1513 = vmatprep.mubr.msk.f32.mxu0 %vm652_vm2, %v340_v54 }
 0x110   :  { %v501_v61 = vpop.permute.xlu1 %500 }
 0x111   :  { %v455_v34 = vpop.permute.xlu0 %454  ;;  %v617_v0 = vsel %vm307_vm10, %v613_v40, %v501_v61 }
 0x112   :  { %v606_v19 = vsel %vm292_vm7, %v2377_v4, %v455_v34 }
 0x114   :  { %v267_v63 = vpop.permute.xlu1 %266 }
 0x115   :  { %v512_v1 = vpop.permute.xlu0 %511  ;;  %v341_v46 = vsel %vm337_vm1, %v336_v30, %v267_v63 }
 0x116   :  { %1514 = vmatmul.mubr.msk.f32.gmra.mrb[2].mxu0 %vm652_vm2, %v341_v46  ;;  %v620_v23 = vsel %vm312_vm11, %v616_v18, %v512_v1 }
 0x118   :  { %v471_v7 = vpop.permute.xlu1 %470 }
 0x119   :  { %v457_v9 = vpop.permute.xlu0 %456  ;;  %v610_v39 = vsel %vm297_vm8, %v606_v19, %v471_v7 }
 0x11a   :  { %v607_v29 = vsel %vm292_vm7, %v603_v47, %v457_v9  ;;  %vm943_vm7 = vcmask 1045509  }
 0x11c   :  { %v525_v38 = vpop.permute.xlu1 %524 }
 0x11d   :  { %v514_v16 = vpop.permute.xlu0 %513  ;;  %v624_v2 = vsel %vm2655_vm12, %v620_v23, %v525_v38 }
 0x11e   :  { %v621_v28 = vsel %vm312_vm11, %v617_v0, %v514_v16 }
 0x120   :  { %v487_v10 = vpop.permute.xlu1 %486 }
 0x121   :  { %v473_v60 = vpop.permute.xlu0 %472  ;;  %v614_v45 = vsel %vm302_vm9, %v610_v39, %v487_v10 }
 0x122   :  { %v611_v41 = vsel %vm297_vm8, %v607_v29, %v473_v60 }
 0x124   :  { %v538_v32 = vpop.permute.xlu1 %537 }
 0x125   :  { %v527_v26 = vpop.permute.xlu0 %526  ;;  %v628_v17 = vsel %vm322_vm13, %v624_v2, %v538_v32 }
 0x126   :  { %v625_v31 = vsel %vm2655_vm12, %v621_v28, %v527_v26 }
 0x128   :  { %v503_v56 = vpop.permute.xlu1 %502 }
 0x129   :  { %v489_v53 = vpop.permute.xlu0 %488  ;;  %v618_v13 = vsel %vm307_vm10, %v614_v45, %v503_v56 }
 0x12a   :  { %v615_v59 = vsel %vm302_vm9, %v611_v41, %v489_v53  ;;  %vm945_vm9 = vcmask 1046534  }
 0x12c   :  { %v551_v58 = vpop.permute.xlu1 %550 }
 0x12d   :  { %v540_v36 = vpop.permute.xlu0 %539  ;;  %v632_v50 = vsel %vm327_vm14, %v628_v17, %v551_v58  ;;  %v2467_v58 = vld [vmem:[%s2649_s2] ss:$0 sm:$0xff] }
 0x12e   :  { %v629_v44 = vsel %vm322_vm13, %v625_v31, %v540_v36 }
 0x130   :  { %v516_v48 = vpop.permute.xlu1 %515 }
 0x131   :  { %v505_v43 = vpop.permute.xlu0 %504  ;;  %v622_v37 = vsel %vm312_vm11, %v618_v13, %v516_v48 }
 0x132   :  { %v619_v54 = vsel %vm307_vm10, %v615_v59, %v505_v43 }
 0x134   :  { %v564_v14 = vpop.permute.xlu1 %563 }
 0x135   :  { %v553_v6 = vpop.permute.xlu0 %552  ;;  %v636_v42 = vsel %vm332_vm15, %v632_v50, %v564_v14  ;;  %v2472_v14 = vld [vmem:[%s2650_s3] ss:$0 sm:$0xff] }
 0x136   :  { %v633_v49 = vsel %vm327_vm14, %v629_v44, %v553_v6 }
 0x138   :  { %v529_v57 = vpop.permute.xlu1 %528 }
 0x139   :  { %v518_v33 = vpop.permute.xlu0 %517  ;;  %v626_v34 = vsel %vm2655_vm12, %v622_v37, %v529_v57 }
 0x13a   :  { %v623_v4 = vsel %vm312_vm11, %v619_v54, %v518_v33  ;;  %vm947_vm11 = vcmask 1047559  }
 0x13c   :  { %v577_v8 = vpop.permute.xlu1 %576 }
 0x13d   :  { %v566_v52 = vpop.permute.xlu0 %565  ;;  %v640_v15 = vsel %vm337_vm1, %v636_v42, %v577_v8 }
 0x13e   :  { %1516 = vmatprep.mubr.msk.f32.mxu0 %vm652_vm2, %v640_v15  ;;  %v637_v22 = vsel %vm332_vm15, %v633_v49, %v566_v52 }
 0x140   :  { %v542_v27 = vpop.permute.xlu1 %541 }
 0x141   :  { %v531_v25 = vpop.permute.xlu0 %530  ;;  %v630_v20 = vsel %vm322_vm13, %v626_v34, %v542_v27 }
 0x142   :  { %v627_v61 = vsel %vm2655_vm12, %v623_v4, %v531_v25  ;;  %vm980_vm12 = vcmask 1044480  }
 0x144   :  { %v544_v12 = vpop.permute.xlu1 %543 }
 0x145   :  { %v579_v24 = vpop.permute.xlu0 %578  ;;  %v631_v3 = vsel %vm322_vm13, %v627_v61, %v544_v12  ;;  %vm949_vm13 = vcmask 1041409  }
 0x146   :  { %v641_v5 = vsel %vm337_vm1, %v637_v22, %v579_v24 }
 0x147   :  { %1517 = vmatmul.mubr.msk.f32.gmra.mrb[4].mxu0 %vm652_vm2, %v641_v5 }
 0x148   :  { %v557_v62 = vpop.permute.xlu1 %556 }
 0x149   :  { %v555_v21 = vpop.permute.xlu0 %554  ;;  %v635_v30 = vsel %vm327_vm14, %v631_v3, %v557_v62 }
 0x14a   :  { %v634_v35 = vsel %vm327_vm14, %v630_v20, %v555_v21  ;;  %vm955_vm14 = vcmask 1042432  }
 0x14c   :  { %v570_v11 = vpop.permute.xlu1 %569 }
 0x14d   :  { %v568_v51 = vpop.permute.xlu0 %567  ;;  %v639_v63 = vsel %vm332_vm15, %v635_v30, %v570_v11 }
 0x14e   :  { %v638_v1 = vsel %vm332_vm15, %v634_v35, %v568_v51  ;;  %vm951_vm15 = vcmask 1042434  }
 0x150   :  { %v583_v9 = vpop.permute.xlu1 %582 }
 0x151   :  { %v581_v46 = vpop.permute.xlu0 %580  ;;  %v643_v16 = vsel %vm337_vm1, %v639_v63, %v583_v9 }
 0x152   :  { %v642_v7 = vsel %vm337_vm1, %v638_v1, %v581_v46  ;;  %vm960_vm1 = vcmask 1046528  }
 0x153   :  { %1519 = vmatprep.mubr.msk.f32.mxu0 %vm652_vm2, %v642_v7 }
 0x154   :  { %1520 = vmatmul.mubr.msk.f32.gmra.mrb[6].mxu0 %vm652_vm2, %v643_v16  ;;  %vm970_vm2 = vcmask 1045504  }
 0x1be   :  { %v1512_v38 = vpop.f32.mrb[0].mxu0 }
 0x1bf   :  { %796 = vrot.lane.b32.xlu1 %v1512_v38, %s1639_s0  ;;  %v747_v60 = vpop.f32.mrb[1].mxu0 }
 0x1c0   :  { %794 = vrot.lane.b32.xlu0 %v747_v60, %s1639_s0 }
 0x1e9   :  { %v2446_v10 = vpop.f32.mrb[2].mxu0 }
 0x1ea   :  { %800 = vrot.lane.b32.xlu1 %v2446_v10, %s1639_s0  ;;  %v2449_v26 = vpop.f32.mrb[3].mxu0 }
 0x1eb   :  { %798 = vrot.lane.b32.xlu0 %v2449_v26, %s1639_s0 }
 0x21a   :  { %v2452_v32 = vpop.f32.mrb[4].mxu0 }
 0x21b   :  { %804 = vrot.lane.b32.xlu1 %v2452_v32, %s1639_s0  ;;  %v2455_v53 = vpop.f32.mrb[5].mxu0 }
 0x21c   :  { %802 = vrot.lane.b32.xlu0 %v2455_v53, %s1639_s0 }
 0x227   :  { %v2458_v56 = vpop.f32.mrb[6].mxu0 }
 0x228   :  { %808 = vrot.lane.b32.xlu1 %v2458_v56, %s1639_s0  ;;  %v2461_v36 = vpop.f32.mrb[7].mxu0 }
 0x229   :  { %806 = vrot.lane.b32.xlu0 %v2461_v36, %s1639_s0 }
 0x231   :  { %v797_v43 = vpop.permute.xlu1 %796 }
 0x232   :  { %v819_v48 = vmax.f32 %v1512_v38, %v797_v43  ;;  %v795_v6 = vpop.permute.xlu0 %794 }
 0x233   :  { %v818_v55 = vmax.f32 %v747_v60, %v795_v6 }
 0x234   :  { %v834_v18 = vmul.f32 %v2467_v58, %v819_v48 }
 0x235   :  { %v833_v23 = vmul.f32 %v2467_v58, %v818_v55 }
 0x236   :  { %v849_v33 = vadd.f32 %v2472_v14, %v834_v18 }
 0x237   :  { %v848_v57 = vadd.f32 %v2472_v14, %v833_v23 }
 0x238   :  { %v857_v2 = vmax.f32 %v849_v33, 0.0 }
 0x239   :  { %v856_v17 = vmax.f32 %v848_v57, 0.0 }
 0x23a   :  { %v869_v50 = vcombine.high %v857_v2, %v857_v2  ;;  %v891_v42 = vsel %vm876_vm3, %v857_v2, -inf }
 0x23b   :  { %v892_v52 = vrot.slane %v891_v42, 4  ;;  %v868_v8 = vcombine.high %v856_v17, %v856_v17  ;;  %v877_v15 = vsel %vm876_vm3, %v856_v17, -inf }
 0x23c   :  { %v898_v40 = vsel %vm876_vm3, %v869_v50, -inf  ;;  %v878_v0 = vrot.slane %v877_v15, 4 }
 0x23d   :  { %v893_v28 = vmax.f32 %v891_v42, %v892_v52  ;;  %v899_v25 = vrot.slane %v898_v40, 4  ;;  %v884_v27 = vsel %vm876_vm3, %v868_v8, -inf }
 0x23e   :  { %v879_v31 = vmax.f32 %v877_v15, %v878_v0  ;;  %v885_v44 = vrot.slane %v884_v27, 4 }
 0x23f   :  { %v894_v49 = vrot.slane %v893_v28, 2  ;;  %v900_v22 = vmax.f32 %v898_v40, %v899_v25 }
 0x240   :  { %v880_v24 = vrot.slane %v879_v31, 2  ;;  %v886_v12 = vmax.f32 %v884_v27, %v885_v44  ;;  %v1008_v44 = vld [vmem:[%s2651_s4 + $0x8] sm:$0xff] }
 0x241   :  { %v895_v5 = vmax.f32 %v893_v28, %v894_v49  ;;  %v901_v47 = vrot.slane %v900_v22, 2 }
 0x242   :  { %v881_v19 = vmax.f32 %v879_v31, %v880_v24  ;;  %v887_v29 = vrot.slane %v886_v12, 2  ;;  %v1007_v31 = vld [vmem:[%s2651_s4] sm:$0xff] }
 0x243   :  { %v902_v21 = vmax.f32 %v900_v22, %v901_v47  ;;  %v896_v41 = vrot.slane %v895_v5, 1  ;;  %v2501_v24 = vpack.c.bf16 %v1008_v44, %v1007_v31 }
 0x244   :  { %v882_v62 = vrot.slane %v881_v19, 1  ;;  %v888_v39 = vmax.f32 %v886_v12, %v887_v29  ;;  %v1009_v29 = vld [vmem:[%s2651_s4 + $0x10] sm:$0xff] }
 0x245   :  { %v903_v45 = vrot.slane %v902_v21, 1  ;;  %v897_v37 = vmax.f32 %v895_v5, %v896_v41  ;;  %1567 = vmatprep.subr.bf16.mxu1 %v2501_v24 }
 0x246   :  { %v889_v59 = vrot.slane %v888_v39, 1  ;;  %v883_v13 = vmax.f32 %v881_v19, %v882_v62  ;;  %1569 = vmatpush3.bf16.msra.mxu1 %v2501_v24 }
 0x247   :  { %v904_v4 = vmax.f32 %v902_v21, %v903_v45  ;;  %v1010_v21 = vld [vmem:[%s2651_s4 + $0x18] sm:$0xff] }
 0x248   :  { %v890_v54 = vmax.f32 %v888_v39, %v889_v59  ;;  %v2517_v45 = vpack.c.bf16 %v1010_v21, %v1009_v29 }
 0x24a   :  { %v942_v51 = vsel %vm941_vm5, %v890_v54, %v883_v13  ;;  %1571 = vmatprep.subr.bf16.mxu1 %v2517_v45 }
 0x24b   :  { %v944_v11 = vsel %vm943_vm7, %v897_v37, %v942_v51  ;;  %1573 = vmatpush3.bf16.msra.mxu1 %v2517_v45  ;;  %v2529_v37 = vld [vmem:[%s2651_s4 + $0x20] sm:$0xff] }
 0x24c   :  { %v946_v34 = vsel %vm945_vm9, %v904_v4, %v944_v11  ;;  %1530 = vmatprep.subr.mxu1 %v2529_v37 }
 0x24f   :  { %1531 = vmatpush3.msra.mxu1 %v2529_v37 }
 0x250   :  { %1575 = vmatprep.subr.bf16.mxu1 %v2501_v24 }
 0x25c   :  { %v801_v61 = vpop.permute.xlu1 %800 }
 0x25d   :  { %v821_v20 = vmax.f32 %v2446_v10, %v801_v61  ;;  %v799_v3 = vpop.permute.xlu0 %798 }
 0x25e   :  { %v820_v35 = vmax.f32 %v2449_v26, %v799_v3 }
 0x25f   :  { %v836_v30 = vmul.f32 %v2467_v58, %v821_v20 }
 0x260   :  { %v835_v1 = vmul.f32 %v2467_v58, %v820_v35 }
 0x261   :  { %v851_v63 = vadd.f32 %v2472_v14, %v836_v30 }
 0x262   :  { %v850_v46 = vadd.f32 %v2472_v14, %v835_v1 }
 0x263   :  { %v859_v9 = vmax.f32 %v851_v63, 0.0 }
 0x264   :  { %v858_v7 = vmax.f32 %v850_v46, 0.0 }
 0x265   :  { %v871_v16 = vcombine.high %v859_v9, %v859_v9  ;;  %v919_v38 = vsel %vm876_vm3, %v859_v9, -inf }
 0x266   :  { %v920_v60 = vrot.slane %v919_v38, 4  ;;  %v870_v43 = vcombine.high %v858_v7, %v858_v7  ;;  %v905_v10 = vsel %vm876_vm3, %v858_v7, -inf }
 0x267   :  { %v926_v48 = vsel %vm876_vm3, %v871_v16, -inf  ;;  %v906_v26 = vrot.slane %v905_v10, 4 }
 0x268   :  { %v921_v6 = vmax.f32 %v919_v38, %v920_v60  ;;  %v927_v55 = vrot.slane %v926_v48, 4  ;;  %v912_v18 = vsel %vm876_vm3, %v870_v43, -inf }
 0x269   :  { %v907_v23 = vmax.f32 %v905_v10, %v906_v26  ;;  %v913_v33 = vrot.slane %v912_v18, 4 }
 0x26a   :  { %v922_v57 = vrot.slane %v921_v6, 2  ;;  %v928_v2 = vmax.f32 %v926_v48, %v927_v55 }
 0x26b   :  { %v908_v17 = vrot.slane %v907_v23, 2  ;;  %v914_v50 = vmax.f32 %v912_v18, %v913_v33 }
 0x26c   :  { %v923_v42 = vmax.f32 %v921_v6, %v922_v57  ;;  %v929_v52 = vrot.slane %v928_v2, 2 }
 0x26d   :  { %v909_v8 = vmax.f32 %v907_v23, %v908_v17  ;;  %v915_v15 = vrot.slane %v914_v50, 2 }
 0x26e   :  { %v930_v40 = vmax.f32 %v928_v2, %v929_v52  ;;  %v924_v0 = vrot.slane %v923_v42, 1 }
 0x26f   :  { %v910_v28 = vrot.slane %v909_v8, 1  ;;  %v916_v25 = vmax.f32 %v914_v50, %v915_v15 }
 0x270   :  { %v931_v27 = vrot.slane %v930_v40, 1  ;;  %v925_v12 = vmax.f32 %v923_v42, %v924_v0 }
 0x271   :  { %v911_v49 = vmax.f32 %v909_v8, %v910_v28  ;;  %v917_v22 = vrot.slane %v916_v25, 1 }
 0x272   :  { %v932_v19 = vmax.f32 %v930_v40, %v931_v27 }
 0x273   :  { %v918_v5 = vmax.f32 %v916_v25, %v917_v22  ;;  %v948_v47 = vsel %vm947_vm11, %v911_v49, %v946_v34 }
 0x274   :  { %v2514_v39 = vsel %vm955_vm14, 0.0, %v948_v47 }
 0x275   :  { %v950_v62 = vsel %vm949_vm13, %v925_v12, %v918_v5  ;;  %v961_v54 = vrot.slane %v2514_v39, 1  ;;  %v971_v11 = vrot.slane %v2514_v39, 2  ;;  %v981_v20 = vrot.slane %v2514_v39, 3 }
 0x276   :  { %v952_v41 = vsel %vm951_vm15, %v932_v19, %v950_v62  ;;  %v990_v30 = vrot.slane %v2514_v39, 4 }
 0x277   :  { %v2520_v59 = vsel %vm955_vm14, %v952_v41, 0.0 }
 0x278   :  { %v962_v13 = vrot.slane %v2520_v59, 1  ;;  %v972_v51 = vrot.slane %v2520_v59, 2  ;;  %v982_v61 = vrot.slane %v2520_v59, 3  ;;  %v991_v35 = vrot.slane %v2520_v59, 4 }
 0x27a   :  { %966 = vrot.lane.b32.xlu1 %v962_v13, %s1624_s28  ;;  %v963_v4 = vsel %vm960_vm1, %v961_v54, %v962_v13  ;;  %v973_v34 = vsel %vm970_vm2, %v971_v11, %v972_v51  ;;  %v983_v3 = vsel %vm980_vm12, %v981_v20, %v982_v61  ;;  %v992_v1 = vsel %vm677_vm0, %v990_v30, %v991_v35 }
 0x27b   :  { %964 = vrot.lane.b32.xlu0 %v963_v4, %s1624_s28 }
 0x27e   :  { %976 = vrot.lane.b32.xlu1 %v972_v51, %s1627_s20 }
 0x27f   :  { %974 = vrot.lane.b32.xlu0 %v973_v34, %s1627_s20 }
 0x282   :  { %986 = vrot.lane.b32.xlu1 %v982_v61, %s1629_s13 }
 0x283   :  { %984 = vrot.lane.b32.xlu0 %v983_v3, %s1629_s13 }
 0x286   :  { %995 = vrot.lane.b32.xlu1 %v991_v35, %s1631_s14 }
 0x287   :  { %993 = vrot.lane.b32.xlu0 %v992_v1, %s1631_s14 }
 0x28d   :  { %v805_v63 = vpop.permute.xlu1 %804 }
 0x28e   :  { %v823_v46 = vmax.f32 %v2452_v32, %v805_v63  ;;  %v803_v9 = vpop.permute.xlu0 %802 }
 0x28f   :  { %v822_v7 = vmax.f32 %v2455_v53, %v803_v9 }
 0x290   :  { %v838_v16 = vmul.f32 %v2467_v58, %v823_v46 }
 0x291   :  { %v837_v38 = vmul.f32 %v2467_v58, %v822_v7 }
 0x292   :  { %v853_v60 = vadd.f32 %v2472_v14, %v838_v16 }
 0x293   :  { %v852_v43 = vadd.f32 %v2472_v14, %v837_v38 }
 0x294   :  { %v861_v10 = vmax.f32 %v853_v60, 0.0 }
 0x295   :  { %v860_v48 = vmax.f32 %v852_v43, 0.0 }
 0x296   :  { %v1138_v26 = vcombine.high %v861_v10, %v861_v10  ;;  %v1159_v6 = vsel %vm876_vm3, %v861_v10, -inf }
 0x297   :  { %v1160_v55 = vrot.slane %v1159_v6, 4  ;;  %v1137_v18 = vcombine.high %v860_v48, %v860_v48  ;;  %v1145_v32 = vsel %vm876_vm3, %v860_v48, -inf }
 0x298   :  { %v1166_v23 = vsel %vm876_vm3, %v1138_v26, -inf  ;;  %v1146_v53 = vrot.slane %v1145_v32, 4 }
 0x299   :  { %v1161_v33 = vmax.f32 %v1159_v6, %v1160_v55  ;;  %v1167_v57 = vrot.slane %v1166_v23, 4  ;;  %v1152_v2 = vsel %vm876_vm3, %v1137_v18, -inf }
 0x29a   :  { %v1147_v17 = vmax.f32 %v1145_v32, %v1146_v53  ;;  %v1153_v50 = vrot.slane %v1152_v2, 4  ;;  %v809_v42 = vpop.permute.xlu1 %808 }
 0x29b   :  { %v1162_v52 = vrot.slane %v1161_v33, 2  ;;  %v1168_v8 = vmax.f32 %v1166_v23, %v1167_v57  ;;  %v825_v15 = vmax.f32 %v2458_v56, %v809_v42  ;;  %v807_v40 = vpop.permute.xlu0 %806 }
 0x29c   :  { %v1148_v0 = vrot.slane %v1147_v17, 2  ;;  %v1154_v28 = vmax.f32 %v1152_v2, %v1153_v50  ;;  %v824_v25 = vmax.f32 %v2461_v36, %v807_v40 }
 0x29d   :  { %v1163_v27 = vmax.f32 %v1161_v33, %v1162_v52  ;;  %v1169_v31 = vrot.slane %v1168_v8, 2  ;;  %v840_v44 = vmul.f32 %v2467_v58, %v825_v15 }
 0x29e   :  { %v1149_v49 = vmax.f32 %v1147_v17, %v1148_v0  ;;  %v1155_v22 = vrot.slane %v1154_v28, 2  ;;  %v839_v12 = vmul.f32 %v2467_v58, %v824_v25 }
 0x29f   :  { %v1170_v5 = vmax.f32 %v1168_v8, %v1169_v31  ;;  %v855_v47 = vadd.f32 %v2472_v14, %v840_v44  ;;  %v1164_v21 = vrot.slane %v1163_v27, 1 }
 0x2a0   :  { %v1150_v19 = vrot.slane %v1149_v49, 1  ;;  %v1156_v29 = vmax.f32 %v1154_v28, %v1155_v22  ;;  %v854_v56 = vadd.f32 %v2472_v14, %v839_v12 }
 0x2a1   :  { %v1171_v62 = vrot.slane %v1170_v5, 1  ;;  %v863_v41 = vmax.f32 %v855_v47, 0.0  ;;  %v1165_v20 = vmax.f32 %v1163_v27, %v1164_v21 }
 0x2a2   :  { %v1157_v13 = vrot.slane %v1156_v29, 1  ;;  %v862_v36 = vmax.f32 %v854_v56, 0.0  ;;  %v1151_v54 = vmax.f32 %v1149_v49, %v1150_v19 }
 0x2a3   :  { %v1140_v4 = vcombine.high %v863_v41, %v863_v41  ;;  %v1187_v51 = vsel %vm876_vm3, %v863_v41, -inf  ;;  %v1172_v3 = vmax.f32 %v1170_v5, %v1171_v62 }
 0x2a4   :  { %v1158_v11 = vmax.f32 %v1156_v29, %v1157_v13  ;;  %v1188_v34 = vrot.slane %v1187_v51, 4  ;;  %v1139_v61 = vcombine.high %v862_v36, %v862_v36  ;;  %v1173_v58 = vsel %vm876_vm3, %v862_v36, -inf }
 0x2a5   :  { %v1194_v35 = vsel %vm876_vm3, %v1140_v4, -inf  ;;  %v1174_v30 = vrot.slane %v1173_v58, 4 }
 0x2a6   :  { %v1209_v14 = vsel %vm941_vm5, %v1158_v11, %v1151_v54  ;;  %v1189_v1 = vmax.f32 %v1187_v51, %v1188_v34  ;;  %v1195_v63 = vrot.slane %v1194_v35, 4  ;;  %v1180_v46 = vsel %vm876_vm3, %v1139_v61, -inf }
 0x2a7   :  { %v1210_v9 = vsel %vm943_vm7, %v1165_v20, %v1209_v14  ;;  %v1175_v7 = vmax.f32 %v1173_v58, %v1174_v30  ;;  %v1181_v16 = vrot.slane %v1180_v46, 4 }
 0x2a8   :  { %v1190_v38 = vrot.slane %v1189_v1, 2  ;;  %v1196_v60 = vmax.f32 %v1194_v35, %v1195_v63  ;;  %v1211_v43 = vsel %vm945_vm9, %v1172_v3, %v1210_v9 }
 0x2a9   :  { %v1176_v10 = vrot.slane %v1175_v7, 2  ;;  %v1182_v48 = vmax.f32 %v1180_v46, %v1181_v16 }
 0x2aa   :  { %v1191_v26 = vmax.f32 %v1189_v1, %v1190_v38  ;;  %v1197_v6 = vrot.slane %v1196_v60, 2 }
 0x2ab   :  { %v1177_v55 = vmax.f32 %v1175_v7, %v1176_v10  ;;  %v1183_v18 = vrot.slane %v1182_v48, 2 }
 0x2ac   :  { %v1198_v32 = vmax.f32 %v1196_v60, %v1197_v6  ;;  %v1192_v23 = vrot.slane %v1191_v26, 1 }
 0x2ad   :  { %v1178_v53 = vrot.slane %v1177_v55, 1  ;;  %v1184_v33 = vmax.f32 %v1182_v48, %v1183_v18  ;;  %v1458_v48 = vld [vmem:[%s2652_s5] ss:$0 sm:$0xff]  ;;  %s1640_s5 = smov [#allocation2]  }
 0x2ae   :  { %v1199_v57 = vrot.slane %v1198_v32, 1  ;;  %v1193_v50 = vmax.f32 %v1191_v26, %v1192_v23 }
 0x2af   :  { %v1179_v2 = vmax.f32 %v1177_v55, %v1178_v53  ;;  %v1185_v17 = vrot.slane %v1184_v33, 1  ;;  %v1459_v55 = vld [vmem:[%s2653_s6] ss:$0 sm:$0xff]  ;;  %s1395_s6 = sshll.u32 %s1640_s5, 4  ;;  %s1396_s6 = int_to_ptr.vmem [resolvable:$true] %s1395_s6 }
 0x2b0   :  { %v1200_v8 = vmax.f32 %v1198_v32, %v1199_v57  ;;  %s1600_s21 = scalar_lea.vmem %s1396_s6, 64  ;;  %p1605_p1 = scmp.lt.s32.totalorder %s1396_s6, %s1396_s6 }
 0x2b1   :  { %v1186_v42 = vmax.f32 %v1184_v33, %v1185_v17  ;;  %v1212_v52 = vsel %vm947_vm11, %v1179_v2, %v1211_v43  ;;  %p1601_p0 = scmp.ne.s32.totalorder %s1396_s6, %s1600_s21  ;;  %p1606_p2 = scmp.lt.s32.totalorder %s1600_s21, %s1600_s21 }
 0x2b2   :  { %v1217_v40 = vsel %vm955_vm14, 0.0, %v1212_v52 }
 0x2b3   :  { %v1213_v15 = vsel %vm949_vm13, %v1193_v50, %v1186_v42  ;;  %v1221_v27 = vrot.slane %v1217_v40, 1  ;;  %v1230_v49 = vrot.slane %v1217_v40, 2  ;;  %v1239_v5 = vrot.slane %v1217_v40, 3  ;;  %p1607_p3 = por %p1606_p2, %p1605_p1 }
 0x2b4   :  { %v1214_v0 = vsel %vm951_vm15, %v1200_v8, %v1213_v15  ;;  %v1248_v29 = vrot.slane %v1217_v40, 4 }
 0x2b5   :  { %v1218_v28 = vsel %vm955_vm14, %v1214_v0, 0.0  ;;  %p1608_p4 = pnand %p1607_p3, %p1601_p0 }
 0x2b6   :  { %v1222_v25 = vrot.slane %v1218_v28, 1  ;;  %v1231_v44 = vrot.slane %v1218_v28, 2  ;;  %v1240_v12 = vrot.slane %v1218_v28, 3  ;;  %v1249_v19 = vrot.slane %v1218_v28, 4 }
 0x2b8   :  { %1226 = vrot.lane.b32.xlu1 %v1222_v25, %s1624_s28  ;;  %v1223_v31 = vsel %vm960_vm1, %v1221_v27, %v1222_v25  ;;  %v1232_v22 = vsel %vm970_vm2, %v1230_v49, %v1231_v44  ;;  %v1241_v47 = vsel %vm980_vm12, %v1239_v5, %v1240_v12  ;;  %v1250_v56 = vsel %vm677_vm0, %v1248_v29, %v1249_v19 }
 0x2b9   :  { %1224 = vrot.lane.b32.xlu0 %v1223_v31, %s1624_s28  ;;  %vm2656_vm0 = vcmask 326656  }
 0x2ba   :  { %vm2657_vm12 = vmmov %vm2656_vm0 }
 0x2bb   :  { %vm2658_vm3 = vmmov %vm2656_vm0 }
 0x2bc   :  { %1235 = vrot.lane.b32.xlu1 %v1231_v44, %s1627_s20  ;;  %vm2659_vm5 = vmmov %vm2656_vm0 }
 0x2bd   :  { %1233 = vrot.lane.b32.xlu0 %v1232_v22, %s1627_s20 }
 0x2c0   :  { %1244 = vrot.lane.b32.xlu1 %v1240_v12, %s1629_s13 }
 0x2c1   :  { %1242 = vrot.lane.b32.xlu0 %v1241_v47, %s1629_s13 }
 0x2c4   :  { %1253 = vrot.lane.b32.xlu1 %v1249_v19, %s1631_s14 }
 0x2c5   :  { %1251 = vrot.lane.b32.xlu0 %v1250_v56, %s1631_s14 }
 0x2ec   :  { %v967_v21 = vpop.permute.xlu1 %966 }
 0x2ed   :  { %v965_v62 = vpop.permute.xlu0 %964  ;;  %v1000_v51 = vsel %vm277_vm4, %v2520_v59, %v967_v21 }
 0x2ee   :  { %v999_v4 = vsel %vm277_vm4, %v2514_v39, %v965_v62 }
 0x2f0   :  { %v977_v41 = vpop.permute.xlu1 %976 }
 0x2f1   :  { %v975_v13 = vpop.permute.xlu0 %974  ;;  %v1002_v61 = vsel %vm287_vm6, %v1000_v51, %v977_v41 }
 0x2f2   :  { %v1001_v11 = vsel %vm287_vm6, %v999_v4, %v975_v13 }
 0x2f4   :  { %v987_v36 = vpop.permute.xlu1 %986 }
 0x2f5   :  { %v985_v54 = vpop.permute.xlu0 %984  ;;  %v1004_v3 = vsel %vm297_vm8, %v1002_v61, %v987_v36 }
 0x2f6   :  { %v1003_v58 = vsel %vm297_vm8, %v1001_v11, %v985_v54 }
 0x2f8   :  { %v996_v34 = vpop.permute.xlu1 %995 }
 0x2f9   :  { %v994_v20 = vpop.permute.xlu0 %993  ;;  %v1006_v30 = vsel %vm307_vm10, %v1004_v3, %v996_v34 }
 0x2fa   :  { %v1005_v35 = vsel %vm307_vm10, %v1003_v58, %v994_v20 }
 0x2fb   :  { %1532 = vmatprep.mubr.msk.f32.mxu1 %vm2656_vm0, %v1005_v35 }
 0x2fc   :  { %1533 = vmatmul.mubr.msk.f32.vlgmr.msra.gmra.mrb[0].mxu1 %vm2657_vm12, %v1006_v30 }
 0x2fd   :  { %1577 = vmatpush3.bf16.msra.mxu1 %v2501_v24 }
 0x2fe   :  { %1579 = vmatprep.subr.bf16.mxu1 %v2517_v45 }
 0x301   :  { %1581 = vmatpush3.bf16.msra.mxu1 %v2517_v45 }
 0x302   :  { %1543 = vmatprep.subr.mxu1 %v2529_v37 }
 0x305   :  { %1544 = vmatpush3.msra.mxu1 %v2529_v37 }
 0x32a   :  { %v1227_v39 = vpop.permute.xlu1 %1226 }
 0x32b   :  { %v1225_v59 = vpop.permute.xlu0 %1224  ;;  %v1258_v7 = vsel %vm277_vm4, %v1218_v28, %v1227_v39 }
 0x32c   :  { %v1257_v9 = vsel %vm277_vm4, %v1217_v40, %v1225_v59  ;;  %vm1112_vm4 = vcmask 125952  }
 0x32e   :  { %v1236_v14 = vpop.permute.xlu1 %1235 }
 0x32f   :  { %v1234_v1 = vpop.permute.xlu0 %1233  ;;  %v1260_v38 = vsel %vm287_vm6, %v1258_v7, %v1236_v14 }
 0x330   :  { %v1259_v24 = vsel %vm287_vm6, %v1257_v9, %v1234_v1  ;;  %vm1131_vm6 = vcmask 123904  }
 0x332   :  { %v1245_v63 = vpop.permute.xlu1 %1244 }
 0x333   :  { %v1243_v46 = vpop.permute.xlu0 %1242  ;;  %v1262_v37 = vsel %vm297_vm8, %v1260_v38, %v1245_v63 }
 0x334   :  { %v1261_v45 = vsel %vm297_vm8, %v1259_v24, %v1243_v46 }
 0x336   :  { %v1254_v16 = vpop.permute.xlu1 %1253 }
 0x337   :  { %v1252_v60 = vpop.permute.xlu0 %1251  ;;  %v1264_v10 = vsel %vm307_vm10, %v1262_v37, %v1254_v16 }
 0x338   :  { %v1263_v43 = vsel %vm307_vm10, %v1261_v45, %v1252_v60 }
 0x339   :  { %1545 = vmatprep.mubr.msk.f32.mxu1 %vm2658_vm3, %v1263_v43 }
 0x33a   :  { %1546 = vmatmul.mubr.msk.f32.vlgmr.msra.gmra.mrb[2].mxu1 %vm2659_vm5, %v1264_v10 }
 0x3cf   :  { %v1534_v26 = vpop.f32.mrb[0].mxu1 }
 0x3d0   :  { %v1084_v6 = vpop.f32.mrb[1].mxu1 }
 0x3d1   :  { %v1099_v18 = vmul.f32 %v1458_v48, %v1084_v6 }
 0x3d3   :  { %v1107_v32 = vadd.f32 %v1459_v55, %v1099_v18 }
 0x3d5   :  { %v1108_v23 = vmax.f32 %v1107_v32, 0.0 }
 0x3d7   :  { %v1110_v53 = vcombine.high %v1108_v23, %v1108_v23  ;;  %v1113_v33 = vsel %vm1112_vm4, %v1108_v23, -inf }
 0x3d8   :  { %v1114_v57 = vrot.slane %v1113_v33, 4 }
 0x3d9   :  { %v1120_v2 = vsel %vm1112_vm4, %v1110_v53, -inf }
 0x3da   :  { %v1115_v17 = vmax.f32 %v1113_v33, %v1114_v57  ;;  %v1121_v50 = vrot.slane %v1120_v2, 4 }
 0x3dc   :  { %v1116_v42 = vrot.slane %v1115_v17, 2  ;;  %v1122_v52 = vmax.f32 %v1120_v2, %v1121_v50 }
 0x3de   :  { %v1117_v8 = vmax.f32 %v1115_v17, %v1116_v42  ;;  %v1123_v15 = vrot.slane %v1122_v52, 2 }
 0x3e0   :  { %v1118_v40 = vrot.slane %v1117_v8, 1  ;;  %v1124_v0 = vmax.f32 %v1122_v52, %v1123_v15 }
 0x3e2   :  { %v1125_v28 = vrot.slane %v1124_v0, 1  ;;  %v1119_v25 = vmax.f32 %v1117_v8, %v1118_v40 }
 0x3e4   :  { %v1126_v27 = vmax.f32 %v1124_v0, %v1125_v28 }
 0x3e6   :  { %v1129_v31 = vsel %vm949_vm13, %v1126_v27, %v1119_v25 }
 0x3e7   :  { %1132 = vst.msk [vmem:[#allocation2] sm:$0x3] %vm1131_vm6, %v1129_v31 }
 0x40d   :  { %v1547_v44 = vpop.f32.mrb[2].mxu1 }
 0x40e   :  { %v1342_v49 = vpop.f32.mrb[3].mxu1 }
 0x40f   :  { %v1357_v22 = vmul.f32 %v1458_v48, %v1342_v49 }
 0x411   :  { %v1365_v12 = vadd.f32 %v1459_v55, %v1357_v22 }
 0x413   :  { %v1366_v5 = vmax.f32 %v1365_v12, 0.0 }
 0x415   :  { %v1368_v47 = vcombine.high %v1366_v5, %v1366_v5  ;;  %v1370_v19 = vsel %vm1112_vm4, %v1366_v5, -inf }
 0x416   :  { %v1371_v29 = vrot.slane %v1370_v19, 4 }
 0x417   :  { %v1377_v56 = vsel %vm1112_vm4, %v1368_v47, -inf }
 0x418   :  { %v1372_v21 = vmax.f32 %v1370_v19, %v1371_v29  ;;  %v1378_v62 = vrot.slane %v1377_v56, 4 }
 0x41a   :  { %v1373_v41 = vrot.slane %v1372_v21, 2  ;;  %v1379_v13 = vmax.f32 %v1377_v56, %v1378_v62 }
 0x41c   :  { %v1374_v36 = vmax.f32 %v1372_v21, %v1373_v41  ;;  %v1380_v54 = vrot.slane %v1379_v13, 2 }
 0x41e   :  { %v1375_v4 = vrot.slane %v1374_v36, 1  ;;  %v1381_v51 = vmax.f32 %v1379_v13, %v1380_v54 }
 0x420   :  { %v1382_v11 = vrot.slane %v1381_v51, 1  ;;  %v1376_v34 = vmax.f32 %v1374_v36, %v1375_v4 }
 0x422   :  { %v1383_v61 = vmax.f32 %v1381_v51, %v1382_v11 }
 0x424   :  { %v1386_v58 = vsel %vm949_vm13, %v1383_v61, %v1376_v34 }
 0x425   :  { %1389 = vst.msk [vmem:[#allocation2 + $0x2] sm:$0x3] %vm1131_vm6, %v1386_v58 }
 0x426   :  { %1611 = shalt.err (!%p1608_p4)
}
 0x427   :  { %s1612_s27 = scalar_lea.hbm %s2654_s7, 64 }
 0x428   :  { %p1613_p5 = scmp.ne.s32.totalorder %s2654_s7, %s1612_s27  ;;  %p1616_p6 = scmp.lt.u32.totalorder %s1612_s27, %s2654_s7 }
 0x42a   :  { %p1618_p7 = pnand %p1616_p6, %p1613_p5 }
 0x42c   :  { %1621 = shalt.err (!%p1618_p7)
}
 0x42d   :  { %s1641_s0 = smov 2  }
 0x42e   :  { %1401 = dma.vmem_to_hbm [thread:$0]  %s1396_s6, 64, %s2654_s7, [#allocation3], %s1631_s14, %s1631_s14, %s1641_s0  }
 0x42f   :  { %1622 = dma.done.wait [#allocation3], 64  }
 0x430   :  { %1623 = vsyncadd [#allocation3], 4294967232 }
 0x431   :  { %1405 = vsyncpa [#allocation3], 1 }

</bundles_post_ra>
